<compile_context>
chip_gen: v7x
topology: tpu7x:2x2x1
jax: 0.10.0
libtpu: 0.0.40
codegen_flags: <defaults>
</compile_context>

<pallas_src>
import functools

import jax
import jax.numpy as jnp
from jax.experimental import pallas as pl
from jax.experimental.pallas import tpu as pltpu

LANE = 128
_VMEM_LIMIT = 32 * 1024 * 1024


def _round_up(x, m):
    return (x + m - 1) // m * m


# ----------------------------- Pallas kernels ------------------------------

def _conv1_kernel(x_ref, w_ref, y_ref, st_ref):
    """One K-packed dot per image: (RO1, K1P) x (K1P, 128) -> packed conv1 rows.

    x_ref:  (RO1, K1P) bf16  3x5 im2col rows (zero pad rows / lanes)
    w_ref:  (K1P, 128) bf16  packed weights (3*Co real output lanes)
    y_ref:  (RO1, 128) bf16  packed conv1 output (3 horizontal taps x Co)
    st_ref: (8, 128)   f32   row 0 = per-lane sum, row 1 = per-lane sum of squares
    """
    acc = jnp.dot(x_ref[...], w_ref[...], preferred_element_type=jnp.float32)
    y_ref[...] = acc.astype(y_ref.dtype)
    # Pad rows of the im2col input are zero, so no validity mask is needed.
    st_ref[0:1, :] = jnp.sum(acc, axis=0, keepdims=True)
    st_ref[1:2, :] = jnp.sum(acc * acc, axis=0, keepdims=True)
    st_ref[2:8, :] = jnp.zeros((6, st_ref.shape[1]), jnp.float32)


def _make_conv2_kernel(H, W, Co, RO1, RPAD):
    """Fused BN1+ReLU -> conv2 (3 vertical-tap dots) -> BN2 partial stats.

    y1_ref:        (RO1, 128)    bf16  packed conv1 output for one image
    s1_ref/b1_ref: (1, 128)      f32   BN1 scale/shift, tiled over the 3 tap groups
    w_ref:         (3, 128, 128) bf16  conv2 weights, one K=128 matrix per vertical tap
    y2_ref:        (RO1, 128)    f32   conv2 output rows (flat y*W + x layout)
    st_ref:        (8, 128)      f32   BN2 partial sum / sum-of-squares
    apad_ref:      (RPAD, 128)   bf16  scratch: W-row zero halos + BN1/ReLU activations
    """
    HW = H * W

    def kernel(y1_ref, s1_ref, b1_ref, w_ref, y2_ref, st_ref, apad_ref):
        Cop = y2_ref.shape[1]

        # BN1 + ReLU fused on the packed conv1 output.
        a1 = jnp.maximum(
            y1_ref[...].astype(jnp.float32) * s1_ref[...] + b1_ref[...], 0.0)

        # Zero the out-of-image horizontal taps (lane-group g=0 at x==0,
        # g=2 at x==W-1) and any row-alignment pad rows.
        r = jax.lax.broadcasted_iota(jnp.int32, (RO1, 1), 0)
        lane = jax.lax.broadcasted_iota(jnp.int32, (RO1, Cop), 1)
        xcol = r % W
        invalid = ((lane < Co) & (xcol == 0)) | \
                  ((lane >= 2 * Co) & (lane < 3 * Co) & (xcol == W - 1))
        if RO1 > HW:
            invalid = invalid | (r >= HW)
        a1 = jnp.where(invalid, 0.0, a1).astype(apad_ref.dtype)

        # Zero only the vertical halos (top W rows, bottom tail); the interior
        # is overwritten every step.  Re-zeroing each step keeps the per-core
        # scratch valid when the grid axis is sharded across TensorCores.
        apad_ref[0:W, :] = jnp.zeros((W, Cop), apad_ref.dtype)
        apad_ref[pl.ds(W + RO1, RPAD - W - RO1), :] = jnp.zeros(
            (RPAD - W - RO1, Cop), apad_ref.dtype)
        apad_ref[pl.ds(W, RO1), :] = a1

        # 3 vertical-tap matmuls (horizontal taps are packed into the K lanes).
        acc = jnp.dot(apad_ref[pl.ds(0, RO1), :], w_ref[0],
                      preferred_element_type=jnp.float32)
        acc = acc + jnp.dot(apad_ref[pl.ds(W, RO1), :], w_ref[1],
                            preferred_element_type=jnp.float32)
        acc = acc + jnp.dot(apad_ref[pl.ds(2 * W, RO1), :], w_ref[2],
                            preferred_element_type=jnp.float32)
        y2_ref[...] = acc.astype(y2_ref.dtype)

        # BN2 partial statistics (mask computed once, reused -- no double multiply).
        if RO1 > HW:
            masked = acc * (r < HW).astype(jnp.float32)
        else:
            masked = acc
        st_ref[0:1, :] = jnp.sum(masked, axis=0, keepdims=True)
        st_ref[1:2, :] = jnp.sum(masked * acc, axis=0, keepdims=True)
        st_ref[2:8, :] = jnp.zeros((6, Cop), jnp.float32)

    return kernel


def _make_pool_kernel(W, Ho, Wo, ROP, pool_type):
    """Fused BN2 + ReLU + 2x2/stride-2 pooling over conv2's flat-row output.

    y2_ref: (RO1, 128) f32;  s2/b2: (1, 128) f32;  o_ref: (ROP, 128) f32.
    Output row i*Wo + j holds the pooled value of spatial position (i, j).
    """
    def kernel(y2_ref, s2_ref, b2_ref, o_ref):
        scale = s2_ref[...]
        shift = b2_ref[...]
        if ROP > Ho * Wo:  # zero only the alignment-pad tail rows
            o_ref[pl.ds(Ho * Wo, ROP - Ho * Wo), :] = jnp.zeros(
                (ROP - Ho * Wo, o_ref.shape[1]), o_ref.dtype)
        # TODO(synk): switch to lax.fori_loop for large Ho to avoid code bloat.
        for i in range(Ho):
            base = 2 * i * W
            win = []
            for d in (0, 1, W, W + 1):  # the 4 taps of a 2x2 window
                v = y2_ref[pl.ds(base + d, Wo, stride=2), :]
                win.append(jnp.maximum(v * scale + shift, 0.0))
            avg = (win[0] + win[1] + win[2] + win[3]) * 0.25
            mx = jnp.maximum(jnp.maximum(win[0], win[1]),
                             jnp.maximum(win[2], win[3]))
            if pool_type == "avg":
                pooled = avg
            elif pool_type == "max":
                pooled = mx
            elif pool_type == "avg+max":
                pooled = avg + mx
            else:
                raise ValueError("Incorrect pool_type!")
            o_ref[pl.ds(i * Wo, Wo), :] = pooled

    return kernel


# ------------------------------ Pallas wrappers -----------------------------

def _conv1_call(xcol, w1p, *, N, RO1, K1P, Cop):
    return pl.pallas_call(
        _conv1_kernel,
        out_shape=(
            jax.ShapeDtypeStruct((N * RO1, Cop), jnp.bfloat16),
            jax.ShapeDtypeStruct((N * 8, Cop), jnp.float32),
        ),
        grid_spec=pltpu.PrefetchScalarGridSpec(
            num_scalar_prefetch=0,
            grid=(N,),
            in_specs=[
                pl.BlockSpec((RO1, K1P), lambda n: (n, 0)),
                pl.BlockSpec((K1P, Cop), lambda n: (0, 0)),     # resident weights
            ],
            out_specs=(
                pl.BlockSpec((RO1, Cop), lambda n: (n, 0)),
                pl.BlockSpec((8, Cop), lambda n: (n, 0)),       # per-image stats
            ),
        ),
        compiler_params=pltpu.CompilerParams(
            dimension_semantics=("parallel",),
            vmem_limit_bytes=_VMEM_LIMIT,
        ),
    )(xcol, w1p)


def _conv2_call(y1, s1p, b1p, w2p, *, N, H, W, Co, RO1, RPAD, Cop, K2P):
    kernel = _make_conv2_kernel(H, W, Co, RO1, RPAD)
    return pl.pallas_call(
        kernel,
        out_shape=(
            jax.ShapeDtypeStruct((N * RO1, Cop), jnp.float32),
            jax.ShapeDtypeStruct((N * 8, Cop), jnp.float32),
        ),
        grid_spec=pltpu.PrefetchScalarGridSpec(
            num_scalar_prefetch=0,
            grid=(N,),
            in_specs=[
                pl.BlockSpec((RO1, Cop), lambda n: (n, 0)),
                pl.BlockSpec((1, Cop), lambda n: (0, 0)),
                pl.BlockSpec((1, Cop), lambda n: (0, 0)),
                pl.BlockSpec((3, K2P, Cop), lambda n: (0, 0, 0)),
            ],
            out_specs=(
                pl.BlockSpec((RO1, Cop), lambda n: (n, 0)),
                pl.BlockSpec((8, Cop), lambda n: (n, 0)),
            ),
            scratch_shapes=[pltpu.VMEM((RPAD, Cop), jnp.bfloat16)],
        ),
        compiler_params=pltpu.CompilerParams(
            dimension_semantics=("parallel",),
            vmem_limit_bytes=_VMEM_LIMIT,
        ),
    )(y1, s1p, b1p, w2p)


def _pool_call(y2, s2, b2, pool_type, *, N, W, Ho, Wo, RO1, ROP, Cop):
    kernel = _make_pool_kernel(W, Ho, Wo, ROP, pool_type)
    return pl.pallas_call(
        kernel,
        out_shape=jax.ShapeDtypeStruct((N * ROP, Cop), jnp.float32),
        grid_spec=pltpu.PrefetchScalarGridSpec(
            num_scalar_prefetch=0,
            grid=(N,),
            in_specs=[
                pl.BlockSpec((RO1, Cop), lambda n: (n, 0)),
                pl.BlockSpec((1, Cop), lambda n: (0, 0)),
                pl.BlockSpec((1, Cop), lambda n: (0, 0)),
            ],
            out_specs=pl.BlockSpec((ROP, Cop), lambda n: (n, 0)),
        ),
        compiler_params=pltpu.CompilerParams(
            dimension_semantics=("parallel",),
            vmem_limit_bytes=_VMEM_LIMIT,
        ),
    )(y2, s2, b2)


# ------------------------------- JAX glue -----------------------------------

def _bn_scale_shift(col_sum, col_ssq, count, eps=1e-5):
    mean = col_sum / count
    var = jnp.maximum(col_ssq / count - mean * mean, 0.0)  # clamp: no rsqrt(neg)
    scale = jax.lax.rsqrt(var + eps)                       # gamma = 1
    shift = -mean * scale                                  # beta = 0
    return scale, shift


def _pack_conv1_weights(w1, Ci, Co, K1P, Cop):
    """(Co,Ci,3,3) -> (K1P, Cop) bf16 producing the 3 horizontal taps at once.

    Row (dy*5 + e)*Ci + c, column g*Co + o holds W1[o, c, dy, e - g] when
    0 <= e - g < 3, else zero, so  im2col(3x5) @ W1p  gives, for flat row
    r = y*W + x, the values conv1(y, x + g - 1, o) at lanes g*Co + o.
    """
    w1t = jnp.transpose(w1, (2, 3, 1, 0))                  # (ky, kx, Ci, Co)
    w1p = jnp.zeros((3, 5, Ci, 3, Co), w1.dtype)
    for g in range(3):                                     # e = g + dx
        w1p = w1p.at[:, g:g + 3, :, g, :].set(w1t)
    w1p = w1p.reshape(15 * Ci, 3 * Co)
    w1p = jnp.pad(w1p, ((0, K1P - 15 * Ci), (0, Cop - 3 * Co)))
    return w1p.astype(jnp.bfloat16)


def _pack_conv2_weights(w2, Co, K2P, Cop):
    """(Co,Co,3,3) -> (3, K2P, Cop) bf16: one K=128 matrix per vertical tap.

    For vertical tap dy, row dx*Co + c, column o holds W2[o, c, dy, dx].
    """
    w2t = jnp.transpose(w2, (2, 3, 1, 0))                  # (ky, kx, Co, Co)
    w2p = w2t.reshape(3, 3 * Co, Co)
    w2p = jnp.pad(w2p, ((0, 0), (0, K2P - 3 * Co), (0, Cop - Co)))
    return w2p.astype(jnp.bfloat16)


def _im2col_3x5(x_nhwc, N, H, W, Ci, RO1, K1P):
    """Lane-dense bf16 3x5 im2col: row y*W + x holds the 3x5 input patch."""
    xp = jnp.pad(x_nhwc, ((0, 0), (1, 1), (2, 2), (0, 0)))   # (N, H+2, W+4, Ci)
    cols = [xp[:, dy:dy + H, e:e + W, :] for dy in range(3) for e in range(5)]
    xcol = jnp.concatenate(cols, axis=-1).reshape(N, H * W, 15 * Ci)
    xcol = jnp.pad(xcol, ((0, 0), (0, RO1 - H * W), (0, K1P - 15 * Ci)))
    return xcol.reshape(N * RO1, K1P).astype(jnp.bfloat16)


@functools.partial(jax.jit, static_argnames=("pool_type",))
def conv_block_forward(x_nchw, w1, w2, pool_type="avg"):
    N, Ci, H, W = x_nchw.shape
    Co = w1.shape[0]
    assert H % 2 == 0 and W % 2 == 0, "2x2 pool expects even spatial dims"
    # TODO(synk): dispatch to the per-tap shifted-matmul scheme for larger channels.
    assert 3 * Co <= LANE and 15 * Ci <= 2 * LANE, "tap K-packing needs small channels"

    Cop = LANE
    K1P = _round_up(15 * Ci, LANE)
    K2P = LANE
    RO1 = _round_up(H * W, 16)                    # conv rows / image (flat y*W + x)
    RPAD = _round_up(2 * W + RO1, 16)             # conv2 scratch rows (W-row halos)
    Ho, Wo = H // 2, W // 2
    ROP = _round_up(Ho * Wo, 8)                   # pooled rows / image
    count = jnp.float32(N * H * W)

    x_nhwc = jnp.transpose(x_nchw, (0, 2, 3, 1)).astype(jnp.float32)
    xcol = _im2col_3x5(x_nhwc, N, H, W, Ci, RO1, K1P)
    w1p = _pack_conv1_weights(w1, Ci, Co, K1P, Cop)
    w2p = _pack_conv2_weights(w2, Co, K2P, Cop)

    # conv1 (single packed dot) + per-image BN1 partial statistics
    y1, st1 = _conv1_call(xcol, w1p, N=N, RO1=RO1, K1P=K1P, Cop=Cop)
    st1 = st1.reshape(N, 8, Cop)
    scale1, shift1 = _bn_scale_shift(st1[:, 0, :].sum(0), st1[:, 1, :].sum(0), count)
    # Real channel c lives in the middle horizontal-tap group (lane Co + c);
    # tile its BN params across the 3 tap groups for conv2's packed input.
    s1c, b1c = scale1[Co:2 * Co], shift1[Co:2 * Co]
    s1p = jnp.zeros((Cop,), jnp.float32).at[:3 * Co].set(jnp.tile(s1c, 3)).reshape(1, Cop)
    b1p = jnp.zeros((Cop,), jnp.float32).at[:3 * Co].set(jnp.tile(b1c, 3)).reshape(1, Cop)

    # BN1 + ReLU fused into conv2 (3 vertical-tap dots) + BN2 partial statistics
    y2, st2 = _conv2_call(y1, s1p, b1p, w2p, N=N, H=H, W=W, Co=Co,
                          RO1=RO1, RPAD=RPAD, Cop=Cop, K2P=K2P)
    st2 = st2.reshape(N, 8, Cop)
    scale2, shift2 = _bn_scale_shift(st2[:, 0, :].sum(0), st2[:, 1, :].sum(0), count)

    # BN2 + ReLU + 2x2 pooling (fused), reading y2 in its natural layout
    pooled = _pool_call(y2, scale2.reshape(1, Cop), shift2.reshape(1, Cop),
                        pool_type, N=N, W=W, Ho=Ho, Wo=Wo, RO1=RO1, ROP=ROP, Cop=Cop)

    out = pooled.reshape(N, ROP, Cop)[:, :Ho * Wo, :Co]
    out = out.reshape(N, Ho, Wo, Co)
    return jnp.transpose(out, (0, 3, 1, 2))               # back to NCHW


# --------------------------------- main --------------------------------------

def _xavier_uniform(key, co, ci, kh=3, kw=3):
    fan_in, fan_out = ci * kh * kw, co * kh * kw
    a = (6.0 / (fan_in + fan_out)) ** 0.5
    return jax.random.uniform(key, (co, ci, kh, kw), jnp.float32, -a, a)


if __name__ == "__main__":
    key = jax.random.PRNGKey(0)
    N, Ci, H, W, Co = 2, 4, 16, 16, 8
    kx, kw1, kw2 = jax.random.split(key, 3)

    x = jax.random.normal(kx, (N, Ci, H, W), jnp.float32)
    w1 = _xavier_uniform(kw1, Co, Ci)     # conv1 weight, no bias
    w2 = _xavier_uniform(kw2, Co, Co)     # conv2 weight, no bias

    out = conv_block_forward(x, w1, w2, pool_type="avg")
    jax.block_until_ready(out)
    assert out.shape == (N, Co, H // 2, W // 2), out.shape
    print("KERNEL_OK")
</pallas_src>

<mosaic_0001>
module attributes {stable_mosaic.version = 11 : i64} {
  func.func @_conv1_kernel(%arg0: i32, %arg1: memref<256x128xbf16, #tpu.memory_space<vmem>>, %arg2: memref<128x128xbf16, #tpu.memory_space<vmem>>, %arg3: memref<256x128xbf16, #tpu.memory_space<vmem>>, %arg4: memref<8x128xf32, #tpu.memory_space<vmem>>) attributes {dimension_semantics = [#tpu.dimension_semantics<parallel>], iteration_bounds = array<i64: 2>, scalar_prefetch = 0 : i64, scratch_operands = 0 : i64, tpu.core_type = #tpu.core_type<tc>, window_params = [{transform_indices = @transform_0, window_bounds = array<i64: 256, 128>}, {pipeline_mode = #tpu.pipeline_mode<synchronous>, transform_indices = @transform_1, window_bounds = array<i64: 128, 128>}, {transform_indices = @transform_2, window_bounds = array<i64: 256, 128>}, {transform_indices = @transform_3, window_bounds = array<i64: 8, 128>}]} {
    %c0 = arith.constant 0 : index
    %c0_0 = arith.constant 0 : index
    %0 = vector.load %arg1[%c0, %c0_0] : memref<256x128xbf16, #tpu.memory_space<vmem>>, vector<256x128xbf16>
    %c0_1 = arith.constant 0 : index
    %c0_2 = arith.constant 0 : index
    %1 = vector.load %arg2[%c0_1, %c0_2] : memref<128x128xbf16, #tpu.memory_space<vmem>>, vector<128x128xbf16>
    %cst = arith.constant dense<0.000000e+00> : vector<256x128xf32>
    %2 = tpu.matmul %0, %1, %cst {dimension_numbers = #tpu.dot_dimension_numbers<[1], [0], [0], [1], [0, 0, 1, 1], [], []>} : vector<256x128xbf16>, vector<128x128xbf16>, vector<256x128xf32> -> vector<256x128xf32>
    %3 = arith.truncf %2 : vector<256x128xf32> to vector<256x128xbf16>
    %c0_3 = arith.constant 0 : index
    %c0_4 = arith.constant 0 : index
    %4 = vector.load %arg3[%c0_3, %c0_4] : memref<256x128xbf16, #tpu.memory_space<vmem>>, vector<256x128xbf16>
    tpu.vector_store %arg3[%c0_3, %c0_4], %3 {strides = array<i32>} : memref<256x128xbf16, #tpu.memory_space<vmem>>, vector<256x128xbf16>,
    %cst_5 = arith.constant dense<0.000000e+00> : vector<128xf32>
    %5 = vector.multi_reduction <add>, %2, %cst_5 [0] : vector<256x128xf32> to vector<128xf32>
    %6 = vector.shape_cast %5 : vector<128xf32> to vector<1x128xf32>
    %c0_6 = arith.constant 0 : index
    %c0_7 = arith.constant 0 : index
    %7 = vector.load %arg4[%c0_6, %c0_7] : memref<8x128xf32, #tpu.memory_space<vmem>>, vector<1x128xf32>
    tpu.vector_store %arg4[%c0_6, %c0_7], %6 {strides = array<i32>} : memref<8x128xf32, #tpu.memory_space<vmem>>, vector<1x128xf32>,
    %8 = arith.mulf %2, %2 : vector<256x128xf32>
    %cst_8 = arith.constant dense<0.000000e+00> : vector<128xf32>
    %9 = vector.multi_reduction <add>, %8, %cst_8 [0] : vector<256x128xf32> to vector<128xf32>
    %10 = vector.shape_cast %9 : vector<128xf32> to vector<1x128xf32>
    %c1 = arith.constant 1 : index
    %c0_9 = arith.constant 0 : index
    %11 = vector.load %arg4[%c1, %c0_9] : memref<8x128xf32, #tpu.memory_space<vmem>>, vector<1x128xf32>
    tpu.vector_store %arg4[%c1, %c0_9], %10 {strides = array<i32>} : memref<8x128xf32, #tpu.memory_space<vmem>>, vector<1x128xf32>,
    %cst_10 = arith.constant 0.000000e+00 : f32
    %12 = vector.broadcast %cst_10 : f32 to vector<6x128xf32>
    %c2 = arith.constant 2 : index
    %c0_11 = arith.constant 0 : index
    %13 = vector.load %arg4[%c2, %c0_11] : memref<8x128xf32, #tpu.memory_space<vmem>>, vector<6x128xf32>
    tpu.vector_store %arg4[%c2, %c0_11], %12 {strides = array<i32>} : memref<8x128xf32, #tpu.memory_space<vmem>>, vector<6x128xf32>,
    return
  }
  func.func @transform_0(%arg0: i32) -> (i32, i32) {
    %c0_i32 = arith.constant 0 : i32
    %c0_i32_0 = arith.constant 0 : i32
    return %arg0, %c0_i32 : i32, i32
  }
  func.func @transform_1(%arg0: i32) -> (i32, i32) {
    %c0_i32 = arith.constant 0 : i32
    %c0_i32_0 = arith.constant 0 : i32
    %c0_i32_1 = arith.constant 0 : i32
    return %c0_i32, %c0_i32_0 : i32, i32
  }
  func.func @transform_2(%arg0: i32) -> (i32, i32) {
    %c0_i32 = arith.constant 0 : i32
    %c0_i32_0 = arith.constant 0 : i32
    return %arg0, %c0_i32 : i32, i32
  }
  func.func @transform_3(%arg0: i32) -> (i32, i32) {
    %c0_i32 = arith.constant 0 : i32
    %c0_i32_0 = arith.constant 0 : i32
    return %arg0, %c0_i32 : i32, i32
  }
}

module attributes {stable_mosaic.version = 11 : i64} {
  func.func @kernel(%arg0: i32, %arg1: memref<256x128xbf16, #tpu.memory_space<vmem>>, %arg2: memref<1x128xf32, #tpu.memory_space<vmem>>, %arg3: memref<1x128xf32, #tpu.memory_space<vmem>>, %arg4: memref<3x128x128xbf16, #tpu.memory_space<vmem>>, %arg5: memref<256x128xf32, #tpu.memory_space<vmem>>, %arg6: memref<8x128xf32, #tpu.memory_space<vmem>>, %arg7: memref<288x128xbf16, #tpu.memory_space<vmem>>) attributes {dimension_semantics = [#tpu.dimension_semantics<parallel>], iteration_bounds = array<i64: 2>, scalar_prefetch = 0 : i64, scratch_operands = 1 : i64, tpu.core_type = #tpu.core_type<tc>, window_params = [{transform_indices = @transform_0, window_bounds = array<i64: 256, 128>}, {pipeline_mode = #tpu.pipeline_mode<synchronous>, transform_indices = @transform_1, window_bounds = array<i64: 1, 128>}, {pipeline_mode = #tpu.pipeline_mode<synchronous>, transform_indices = @transform_2, window_bounds = array<i64: 1, 128>}, {pipeline_mode = #tpu.pipeline_mode<synchronous>, transform_indices = @transform_3, window_bounds = array<i64: 3, 128, 128>}, {transform_indices = @transform_4, window_bounds = array<i64: 256, 128>}, {transform_indices = @transform_5, window_bounds = array<i64: 8, 128>}]} {
    %c0 = arith.constant 0 : index
    %c0_0 = arith.constant 0 : index
    %0 = vector.load %arg1[%c0, %c0_0] : memref<256x128xbf16, #tpu.memory_space<vmem>>, vector<256x128xbf16>
    %1 = arith.extf %0 : vector<256x128xbf16> to vector<256x128xf32>
    %c0_1 = arith.constant 0 : index
    %c0_2 = arith.constant 0 : index
    %2 = vector.load %arg2[%c0_1, %c0_2] : memref<1x128xf32, #tpu.memory_space<vmem>>, vector<1x128xf32>
    %3 = vector.broadcast %2 : vector<1x128xf32> to vector<256x128xf32>
    %4 = arith.mulf %1, %3 : vector<256x128xf32>
    %c0_3 = arith.constant 0 : index
    %c0_4 = arith.constant 0 : index
    %5 = vector.load %arg3[%c0_3, %c0_4] : memref<1x128xf32, #tpu.memory_space<vmem>>, vector<1x128xf32>
    %6 = vector.broadcast %5 : vector<1x128xf32> to vector<256x128xf32>
    %7 = arith.addf %4, %6 : vector<256x128xf32>
    %cst = arith.constant 0.000000e+00 : f32
    %8 = vector.broadcast %cst : f32 to vector<256x128xf32>
    %9 = arith.maximumf %7, %8 : vector<256x128xf32>
    %10 = tpu.iota {dimensions = array<i32: 0>} : vector<256x1xi32>
    %11 = tpu.iota {dimensions = array<i32: 1>} : vector<256x128xi32>
    %c16_i32 = arith.constant 16 : i32
    %c0_i32 = arith.constant 0 : i32
    %12 = arith.cmpi eq, %c16_i32, %c0_i32 : i32
    %c1_i32 = arith.constant 1 : i32
    %13 = arith.select %12, %c1_i32, %c16_i32 : i32
    %14 = vector.broadcast %13 : i32 to vector<256x1xi32>
    %15 = arith.remsi %10, %14 : vector<256x1xi32>
    %c0_i32_5 = arith.constant 0 : i32
    %16 = vector.broadcast %c0_i32_5 : i32 to vector<256x1xi32>
    %17 = arith.cmpi ne, %15, %16 : vector<256x1xi32>
    %c0_i32_6 = arith.constant 0 : i32
    %18 = vector.broadcast %c0_i32_6 : i32 to vector<256x1xi32>
    %19 = arith.cmpi slt, %15, %18 : vector<256x1xi32>
    %c0_i32_7 = arith.constant 0 : i32
    %20 = arith.cmpi slt, %13, %c0_i32_7 : i32
    %21 = vector.broadcast %20 : i1 to vector<256x1xi1>
    %22 = vector.broadcast %21 : vector<256x1xi1> to vector<256x1xi1>
    %23 = arith.xori %19, %22 : vector<256x1xi1>
    %24 = arith.andi %23, %17 : vector<256x1xi1>
    %25 = vector.broadcast %13 : i32 to vector<256x1xi32>
    %26 = arith.addi %15, %25 : vector<256x1xi32>
    %27 = arith.select %24, %26, %15 : vector<256x1xi1>, vector<256x1xi32>
    %c8_i32 = arith.constant 8 : i32
    %28 = vector.broadcast %c8_i32 : i32 to vector<256x128xi32>
    %29 = arith.cmpi slt, %11, %28 : vector<256x128xi32>
    %c0_i32_8 = arith.constant 0 : i32
    %30 = vector.broadcast %c0_i32_8 : i32 to vector<256x1xi32>
    %31 = arith.cmpi eq, %27, %30 : vector<256x1xi32>
    %32 = vector.broadcast %31 : vector<256x1xi1> to vector<256x128xi1>
    %33 = arith.andi %29, %32 : vector<256x128xi1>
    %c16_i32_9 = arith.constant 16 : i32
    %34 = vector.broadcast %c16_i32_9 : i32 to vector<256x128xi32>
    %35 = arith.cmpi sge, %11, %34 : vector<256x128xi32>
    %c24_i32 = arith.constant 24 : i32
    %36 = vector.broadcast %c24_i32 : i32 to vector<256x128xi32>
    %37 = arith.cmpi slt, %11, %36 : vector<256x128xi32>
    %38 = arith.andi %35, %37 : vector<256x128xi1>
    %c15_i32 = arith.constant 15 : i32
    %39 = vector.broadcast %c15_i32 : i32 to vector<256x1xi32>
    %40 = arith.cmpi eq, %27, %39 : vector<256x1xi32>
    %41 = vector.broadcast %40 : vector<256x1xi1> to vector<256x128xi1>
    %42 = arith.andi %38, %41 : vector<256x128xi1>
    %43 = arith.ori %33, %42 : vector<256x128xi1>
    %cst_10 = arith.constant 0.000000e+00 : f32
    %44 = vector.broadcast %cst_10 : f32 to vector<256x128xf32>
    %45 = arith.select %43, %44, %9 : vector<256x128xi1>, vector<256x128xf32>
    %46 = arith.truncf %45 : vector<256x128xf32> to vector<256x128xbf16>
    %cst_11 = arith.constant 0.000000e+00 : bf16
    %47 = vector.broadcast %cst_11 : bf16 to vector<16x128xbf16>
    %c0_12 = arith.constant 0 : index
    %c0_13 = arith.constant 0 : index
    %48 = vector.load %arg7[%c0_12, %c0_13] : memref<288x128xbf16, #tpu.memory_space<vmem>>, vector<16x128xbf16>
    tpu.vector_store %arg7[%c0_12, %c0_13], %47 {strides = array<i32>} : memref<288x128xbf16, #tpu.memory_space<vmem>>, vector<16x128xbf16>,
    %cst_14 = arith.constant 0.000000e+00 : bf16
    %49 = vector.broadcast %cst_14 : bf16 to vector<16x128xbf16>
    %c272 = arith.constant 272 : index
    %c0_15 = arith.constant 0 : index
    %50 = vector.load %arg7[%c272, %c0_15] : memref<288x128xbf16, #tpu.memory_space<vmem>>, vector<16x128xbf16>
    tpu.vector_store %arg7[%c272, %c0_15], %49 {strides = array<i32>} : memref<288x128xbf16, #tpu.memory_space<vmem>>, vector<16x128xbf16>,
    %c16 = arith.constant 16 : index
    %c0_16 = arith.constant 0 : index
    %51 = vector.load %arg7[%c16, %c0_16] : memref<288x128xbf16, #tpu.memory_space<vmem>>, vector<256x128xbf16>
    tpu.vector_store %arg7[%c16, %c0_16], %46 {strides = array<i32>} : memref<288x128xbf16, #tpu.memory_space<vmem>>, vector<256x128xbf16>,
    %c0_17 = arith.constant 0 : index
    %c0_18 = arith.constant 0 : index
    %52 = vector.load %arg7[%c0_17, %c0_18] : memref<288x128xbf16, #tpu.memory_space<vmem>>, vector<256x128xbf16>
    %c0_19 = arith.constant 0 : index
    %c0_20 = arith.constant 0 : index
    %c0_21 = arith.constant 0 : index
    %53 = vector.load %arg4[%c0_19, %c0_20, %c0_21] : memref<3x128x128xbf16, #tpu.memory_space<vmem>>, vector<1x128x128xbf16>
    %54 = vector.shape_cast %53 : vector<1x128x128xbf16> to vector<128x128xbf16>
    %cst_22 = arith.constant dense<0.000000e+00> : vector<256x128xf32>
    %55 = tpu.matmul %52, %54, %cst_22 {dimension_numbers = #tpu.dot_dimension_numbers<[1], [0], [0], [1], [0, 0, 1, 1], [], []>} : vector<256x128xbf16>, vector<128x128xbf16>, vector<256x128xf32> -> vector<256x128xf32>
    %c16_23 = arith.constant 16 : index
    %c0_24 = arith.constant 0 : index
    %56 = vector.load %arg7[%c16_23, %c0_24] : memref<288x128xbf16, #tpu.memory_space<vmem>>, vector<256x128xbf16>
    %c1 = arith.constant 1 : index
    %c0_25 = arith.constant 0 : index
    %c0_26 = arith.constant 0 : index
    %57 = vector.load %arg4[%c1, %c0_25, %c0_26] : memref<3x128x128xbf16, #tpu.memory_space<vmem>>, vector<1x128x128xbf16>
    %58 = vector.shape_cast %57 : vector<1x128x128xbf16> to vector<128x128xbf16>
    %cst_27 = arith.constant dense<0.000000e+00> : vector<256x128xf32>
    %59 = tpu.matmul %56, %58, %cst_27 {dimension_numbers = #tpu.dot_dimension_numbers<[1], [0], [0], [1], [0, 0, 1, 1], [], []>} : vector<256x128xbf16>, vector<128x128xbf16>, vector<256x128xf32> -> vector<256x128xf32>
    %60 = arith.addf %55, %59 : vector<256x128xf32>
    %c32 = arith.constant 32 : index
    %c0_28 = arith.constant 0 : index
    %61 = vector.load %arg7[%c32, %c0_28] : memref<288x128xbf16, #tpu.memory_space<vmem>>, vector<256x128xbf16>
    %c2 = arith.constant 2 : index
    %c0_29 = arith.constant 0 : index
    %c0_30 = arith.constant 0 : index
    %62 = vector.load %arg4[%c2, %c0_29, %c0_30] : memref<3x128x128xbf16, #tpu.memory_space<vmem>>, vector<1x128x128xbf16>
    %63 = vector.shape_cast %62 : vector<1x128x128xbf16> to vector<128x128xbf16>
    %cst_31 = arith.constant dense<0.000000e+00> : vector<256x128xf32>
    %64 = tpu.matmul %61, %63, %cst_31 {dimension_numbers = #tpu.dot_dimension_numbers<[1], [0], [0], [1], [0, 0, 1, 1], [], []>} : vector<256x128xbf16>, vector<128x128xbf16>, vector<256x128xf32> -> vector<256x128xf32>
    %65 = arith.addf %60, %64 : vector<256x128xf32>
    %c0_32 = arith.constant 0 : index
    %c0_33 = arith.constant 0 : index
    %66 = vector.load %arg5[%c0_32, %c0_33] : memref<256x128xf32, #tpu.memory_space<vmem>>, vector<256x128xf32>
    tpu.vector_store %arg5[%c0_32, %c0_33], %65 {strides = array<i32>} : memref<256x128xf32, #tpu.memory_space<vmem>>, vector<256x128xf32>,
    %cst_34 = arith.constant dense<0.000000e+00> : vector<128xf32>
    %67 = vector.multi_reduction <add>, %65, %cst_34 [0] : vector<256x128xf32> to vector<128xf32>
    %68 = vector.shape_cast %67 : vector<128xf32> to vector<1x128xf32>
    %c0_35 = arith.constant 0 : index
    %c0_36 = arith.constant 0 : index
    %69 = vector.load %arg6[%c0_35, %c0_36] : memref<8x128xf32, #tpu.memory_space<vmem>>, vector<1x128xf32>
    tpu.vector_store %arg6[%c0_35, %c0_36], %68 {strides = array<i32>} : memref<8x128xf32, #tpu.memory_space<vmem>>, vector<1x128xf32>,
    %70 = arith.mulf %65, %65 : vector<256x128xf32>
    %cst_37 = arith.constant dense<0.000000e+00> : vector<128xf32>
    %71 = vector.multi_reduction <add>, %70, %cst_37 [0] : vector<256x128xf32> to vector<128xf32>
    %72 = vector.shape_cast %71 : vector<128xf32> to vector<1x128xf32>
    %c1_38 = arith.constant 1 : index
    %c0_39 = arith.constant 0 : index
    %73 = vector.load %arg6[%c1_38, %c0_39] : memref<8x128xf32, #tpu.memory_space<vmem>>, vector<1x128xf32>
    tpu.vector_store %arg6[%c1_38, %c0_39], %72 {strides = array<i32>} : memref<8x128xf32, #tpu.memory_space<vmem>>, vector<1x128xf32>,
    %cst_40 = arith.constant 0.000000e+00 : f32
    %74 = vector.broadcast %cst_40 : f32 to vector<6x128xf32>
    %c2_41 = arith.constant 2 : index
    %c0_42 = arith.constant 0 : index
    %75 = vector.load %arg6[%c2_41, %c0_42] : memref<8x128xf32, #tpu.memory_space<vmem>>, vector<6x128xf32>
    tpu.vector_store %arg6[%c2_41, %c0_42], %74 {strides = array<i32>} : memref<8x128xf32, #tpu.memory_space<vmem>>, vector<6x128xf32>,
    return
  }
  func.func @transform_0(%arg0: i32) -> (i32, i32) {
    %c0_i32 = arith.constant 0 : i32
    %c0_i32_0 = arith.constant 0 : i32
    return %arg0, %c0_i32 : i32, i32
  }
  func.func @transform_1(%arg0: i32) -> (i32, i32) {
    %c0_i32 = arith.constant 0 : i32
    %c0_i32_0 = arith.constant 0 : i32
    %c0_i32_1 = arith.constant 0 : i32
    return %c0_i32, %c0_i32_0 : i32, i32
  }
  func.func @transform_2(%arg0: i32) -> (i32, i32) {
    %c0_i32 = arith.constant 0 : i32
    %c0_i32_0 = arith.constant 0 : i32
    %c0_i32_1 = arith.constant 0 : i32
    return %c0_i32, %c0_i32_0 : i32, i32
  }
  func.func @transform_3(%arg0: i32) -> (i32, i32, i32) {
    %c0_i32 = arith.constant 0 : i32
    %c0_i32_0 = arith.constant 0 : i32
    %c0_i32_1 = arith.constant 0 : i32
    %c0_i32_2 = arith.constant 0 : i32
    return %c0_i32, %c0_i32_0, %c0_i32_1 : i32, i32, i32
  }
  func.func @transform_4(%arg0: i32) -> (i32, i32) {
    %c0_i32 = arith.constant 0 : i32
    %c0_i32_0 = arith.constant 0 : i32
    return %arg0, %c0_i32 : i32, i32
  }
  func.func @transform_5(%arg0: i32) -> (i32, i32) {
    %c0_i32 = arith.constant 0 : i32
    %c0_i32_0 = arith.constant 0 : i32
    return %arg0, %c0_i32 : i32, i32
  }
}

module attributes {stable_mosaic.version = 11 : i64} {
  func.func @kernel(%arg0: i32, %arg1: memref<256x128xf32, #tpu.memory_space<vmem>>, %arg2: memref<1x128xf32, #tpu.memory_space<vmem>>, %arg3: memref<1x128xf32, #tpu.memory_space<vmem>>, %arg4: memref<64x128xf32, #tpu.memory_space<vmem>>) attributes {dimension_semantics = [#tpu.dimension_semantics<parallel>], iteration_bounds = array<i64: 2>, scalar_prefetch = 0 : i64, scratch_operands = 0 : i64, tpu.core_type = #tpu.core_type<tc>, window_params = [{transform_indices = @transform_0, window_bounds = array<i64: 256, 128>}, {pipeline_mode = #tpu.pipeline_mode<synchronous>, transform_indices = @transform_1, window_bounds = array<i64: 1, 128>}, {pipeline_mode = #tpu.pipeline_mode<synchronous>, transform_indices = @transform_2, window_bounds = array<i64: 1, 128>}, {transform_indices = @transform_3, window_bounds = array<i64: 64, 128>}]} {
    %c0 = arith.constant 0 : index
    %c0_0 = arith.constant 0 : index
    %0 = vector.load %arg2[%c0, %c0_0] : memref<1x128xf32, #tpu.memory_space<vmem>>, vector<1x128xf32>
    %c0_1 = arith.constant 0 : index
    %c0_2 = arith.constant 0 : index
    %1 = vector.load %arg3[%c0_1, %c0_2] : memref<1x128xf32, #tpu.memory_space<vmem>>, vector<1x128xf32>
    %c0_3 = arith.constant 0 : index
    %c0_4 = arith.constant 0 : index
    %2 = tpu.strided_load %arg1[%c0_3, %c0_4] {strides = array<i32: 2, 1>} : memref<256x128xf32, #tpu.memory_space<vmem>>, vector<8x128xf32>
    %3 = vector.broadcast %0 : vector<1x128xf32> to vector<8x128xf32>
    %4 = arith.mulf %2, %3 : vector<8x128xf32>
    %5 = vector.broadcast %1 : vector<1x128xf32> to vector<8x128xf32>
    %6 = arith.addf %4, %5 : vector<8x128xf32>
    %cst = arith.constant 0.000000e+00 : f32
    %7 = vector.broadcast %cst : f32 to vector<8x128xf32>
    %8 = arith.maximumf %6, %7 : vector<8x128xf32>
    %c1 = arith.constant 1 : index
    %c0_5 = arith.constant 0 : index
    %9 = tpu.strided_load %arg1[%c1, %c0_5] {strides = array<i32: 2, 1>} : memref<256x128xf32, #tpu.memory_space<vmem>>, vector<8x128xf32>
    %10 = vector.broadcast %0 : vector<1x128xf32> to vector<8x128xf32>
    %11 = arith.mulf %9, %10 : vector<8x128xf32>
    %12 = vector.broadcast %1 : vector<1x128xf32> to vector<8x128xf32>
    %13 = arith.addf %11, %12 : vector<8x128xf32>
    %cst_6 = arith.constant 0.000000e+00 : f32
    %14 = vector.broadcast %cst_6 : f32 to vector<8x128xf32>
    %15 = arith.maximumf %13, %14 : vector<8x128xf32>
    %c16 = arith.constant 16 : index
    %c0_7 = arith.constant 0 : index
    %16 = tpu.strided_load %arg1[%c16, %c0_7] {strides = array<i32: 2, 1>} : memref<256x128xf32, #tpu.memory_space<vmem>>, vector<8x128xf32>
    %17 = vector.broadcast %0 : vector<1x128xf32> to vector<8x128xf32>
    %18 = arith.mulf %16, %17 : vector<8x128xf32>
    %19 = vector.broadcast %1 : vector<1x128xf32> to vector<8x128xf32>
    %20 = arith.addf %18, %19 : vector<8x128xf32>
    %cst_8 = arith.constant 0.000000e+00 : f32
    %21 = vector.broadcast %cst_8 : f32 to vector<8x128xf32>
    %22 = arith.maximumf %20, %21 : vector<8x128xf32>
    %c17 = arith.constant 17 : index
    %c0_9 = arith.constant 0 : index
    %23 = tpu.strided_load %arg1[%c17, %c0_9] {strides = array<i32: 2, 1>} : memref<256x128xf32, #tpu.memory_space<vmem>>, vector<8x128xf32>
    %24 = vector.broadcast %0 : vector<1x128xf32> to vector<8x128xf32>
    %25 = arith.mulf %23, %24 : vector<8x128xf32>
    %26 = vector.broadcast %1 : vector<1x128xf32> to vector<8x128xf32>
    %27 = arith.addf %25, %26 : vector<8x128xf32>
    %cst_10 = arith.constant 0.000000e+00 : f32
    %28 = vector.broadcast %cst_10 : f32 to vector<8x128xf32>
    %29 = arith.maximumf %27, %28 : vector<8x128xf32>
    %30 = arith.addf %8, %15 : vector<8x128xf32>
    %31 = arith.addf %30, %22 : vector<8x128xf32>
    %32 = arith.addf %31, %29 : vector<8x128xf32>
    %cst_11 = arith.constant 2.500000e-01 : f32
    %33 = vector.broadcast %cst_11 : f32 to vector<8x128xf32>
    %34 = arith.mulf %32, %33 : vector<8x128xf32>
    %c0_12 = arith.constant 0 : index
    %c0_13 = arith.constant 0 : index
    %35 = vector.load %arg4[%c0_12, %c0_13] : memref<64x128xf32, #tpu.memory_space<vmem>>, vector<8x128xf32>
    tpu.vector_store %arg4[%c0_12, %c0_13], %34 {strides = array<i32>} : memref<64x128xf32, #tpu.memory_space<vmem>>, vector<8x128xf32>,
    %c32 = arith.constant 32 : index
    %c0_14 = arith.constant 0 : index
    %36 = tpu.strided_load %arg1[%c32, %c0_14] {strides = array<i32: 2, 1>} : memref<256x128xf32, #tpu.memory_space<vmem>>, vector<8x128xf32>
    %37 = vector.broadcast %0 : vector<1x128xf32> to vector<8x128xf32>
    %38 = arith.mulf %36, %37 : vector<8x128xf32>
    %39 = vector.broadcast %1 : vector<1x128xf32> to vector<8x128xf32>
    %40 = arith.addf %38, %39 : vector<8x128xf32>
    %cst_15 = arith.constant 0.000000e+00 : f32
    %41 = vector.broadcast %cst_15 : f32 to vector<8x128xf32>
    %42 = arith.maximumf %40, %41 : vector<8x128xf32>
    %c33 = arith.constant 33 : index
    %c0_16 = arith.constant 0 : index
    %43 = tpu.strided_load %arg1[%c33, %c0_16] {strides = array<i32: 2, 1>} : memref<256x128xf32, #tpu.memory_space<vmem>>, vector<8x128xf32>
    %44 = vector.broadcast %0 : vector<1x128xf32> to vector<8x128xf32>
    %45 = arith.mulf %43, %44 : vector<8x128xf32>
    %46 = vector.broadcast %1 : vector<1x128xf32> to vector<8x128xf32>
    %47 = arith.addf %45, %46 : vector<8x128xf32>
    %cst_17 = arith.constant 0.000000e+00 : f32
    %48 = vector.broadcast %cst_17 : f32 to vector<8x128xf32>
    %49 = arith.maximumf %47, %48 : vector<8x128xf32>
    %c48 = arith.constant 48 : index
    %c0_18 = arith.constant 0 : index
    %50 = tpu.strided_load %arg1[%c48, %c0_18] {strides = array<i32: 2, 1>} : memref<256x128xf32, #tpu.memory_space<vmem>>, vector<8x128xf32>
    %51 = vector.broadcast %0 : vector<1x128xf32> to vector<8x128xf32>
    %52 = arith.mulf %50, %51 : vector<8x128xf32>
    %53 = vector.broadcast %1 : vector<1x128xf32> to vector<8x128xf32>
    %54 = arith.addf %52, %53 : vector<8x128xf32>
    %cst_19 = arith.constant 0.000000e+00 : f32
    %55 = vector.broadcast %cst_19 : f32 to vector<8x128xf32>
    %56 = arith.maximumf %54, %55 : vector<8x128xf32>
    %c49 = arith.constant 49 : index
    %c0_20 = arith.constant 0 : index
    %57 = tpu.strided_load %arg1[%c49, %c0_20] {strides = array<i32: 2, 1>} : memref<256x128xf32, #tpu.memory_space<vmem>>, vector<8x128xf32>
    %58 = vector.broadcast %0 : vector<1x128xf32> to vector<8x128xf32>
    %59 = arith.mulf %57, %58 : vector<8x128xf32>
    %60 = vector.broadcast %1 : vector<1x128xf32> to vector<8x128xf32>
    %61 = arith.addf %59, %60 : vector<8x128xf32>
    %cst_21 = arith.constant 0.000000e+00 : f32
    %62 = vector.broadcast %cst_21 : f32 to vector<8x128xf32>
    %63 = arith.maximumf %61, %62 : vector<8x128xf32>
    %64 = arith.addf %42, %49 : vector<8x128xf32>
    %65 = arith.addf %64, %56 : vector<8x128xf32>
    %66 = arith.addf %65, %63 : vector<8x128xf32>
    %cst_22 = arith.constant 2.500000e-01 : f32
    %67 = vector.broadcast %cst_22 : f32 to vector<8x128xf32>
    %68 = arith.mulf %66, %67 : vector<8x128xf32>
    %c8 = arith.constant 8 : index
    %c0_23 = arith.constant 0 : index
    %69 = vector.load %arg4[%c8, %c0_23] : memref<64x128xf32, #tpu.memory_space<vmem>>, vector<8x128xf32>
    tpu.vector_store %arg4[%c8, %c0_23], %68 {strides = array<i32>} : memref<64x128xf32, #tpu.memory_space<vmem>>, vector<8x128xf32>,
    %c64 = arith.constant 64 : index
    %c0_24 = arith.constant 0 : index
    %70 = tpu.strided_load %arg1[%c64, %c0_24] {strides = array<i32: 2, 1>} : memref<256x128xf32, #tpu.memory_space<vmem>>, vector<8x128xf32>
    %71 = vector.broadcast %0 : vector<1x128xf32> to vector<8x128xf32>
    %72 = arith.mulf %70, %71 : vector<8x128xf32>
    %73 = vector.broadcast %1 : vector<1x128xf32> to vector<8x128xf32>
    %74 = arith.addf %72, %73 : vector<8x128xf32>
    %cst_25 = arith.constant 0.000000e+00 : f32
    %75 = vector.broadcast %cst_25 : f32 to vector<8x128xf32>
    %76 = arith.maximumf %74, %75 : vector<8x128xf32>
    %c65 = arith.constant 65 : index
    %c0_26 = arith.constant 0 : index
    %77 = tpu.strided_load %arg1[%c65, %c0_26] {strides = array<i32: 2, 1>} : memref<256x128xf32, #tpu.memory_space<vmem>>, vector<8x128xf32>
    %78 = vector.broadcast %0 : vector<1x128xf32> to vector<8x128xf32>
    %79 = arith.mulf %77, %78 : vector<8x128xf32>
    %80 = vector.broadcast %1 : vector<1x128xf32> to vector<8x128xf32>
    %81 = arith.addf %79, %80 : vector<8x128xf32>
    %cst_27 = arith.constant 0.000000e+00 : f32
    %82 = vector.broadcast %cst_27 : f32 to vector<8x128xf32>
    %83 = arith.maximumf %81, %82 : vector<8x128xf32>
    %c80 = arith.constant 80 : index
    %c0_28 = arith.constant 0 : index
    %84 = tpu.strided_load %arg1[%c80, %c0_28] {strides = array<i32: 2, 1>} : memref<256x128xf32, #tpu.memory_space<vmem>>, vector<8x128xf32>
    %85 = vector.broadcast %0 : vector<1x128xf32> to vector<8x128xf32>
    %86 = arith.mulf %84, %85 : vector<8x128xf32>
    %87 = vector.broadcast %1 : vector<1x128xf32> to vector<8x128xf32>
    %88 = arith.addf %86, %87 : vector<8x128xf32>
    %cst_29 = arith.constant 0.000000e+00 : f32
    %89 = vector.broadcast %cst_29 : f32 to vector<8x128xf32>
    %90 = arith.maximumf %88, %89 : vector<8x128xf32>
    %c81 = arith.constant 81 : index
    %c0_30 = arith.constant 0 : index
    %91 = tpu.strided_load %arg1[%c81, %c0_30] {strides = array<i32: 2, 1>} : memref<256x128xf32, #tpu.memory_space<vmem>>, vector<8x128xf32>
    %92 = vector.broadcast %0 : vector<1x128xf32> to vector<8x128xf32>
    %93 = arith.mulf %91, %92 : vector<8x128xf32>
    %94 = vector.broadcast %1 : vector<1x128xf32> to vector<8x128xf32>
    %95 = arith.addf %93, %94 : vector<8x128xf32>
    %cst_31 = arith.constant 0.000000e+00 : f32
    %96 = vector.broadcast %cst_31 : f32 to vector<8x128xf32>
    %97 = arith.maximumf %95, %96 : vector<8x128xf32>
    %98 = arith.addf %76, %83 : vector<8x128xf32>
    %99 = arith.addf %98, %90 : vector<8x128xf32>
    %100 = arith.addf %99, %97 : vector<8x128xf32>
    %cst_32 = arith.constant 2.500000e-01 : f32
    %101 = vector.broadcast %cst_32 : f32 to vector<8x128xf32>
    %102 = arith.mulf %100, %101 : vector<8x128xf32>
    %c16_33 = arith.constant 16 : index
    %c0_34 = arith.constant 0 : index
    %103 = vector.load %arg4[%c16_33, %c0_34] : memref<64x128xf32, #tpu.memory_space<vmem>>, vector<8x128xf32>
    tpu.vector_store %arg4[%c16_33, %c0_34], %102 {strides = array<i32>} : memref<64x128xf32, #tpu.memory_space<vmem>>, vector<8x128xf32>,
    %c96 = arith.constant 96 : index
    %c0_35 = arith.constant 0 : index
    %104 = tpu.strided_load %arg1[%c96, %c0_35] {strides = array<i32: 2, 1>} : memref<256x128xf32, #tpu.memory_space<vmem>>, vector<8x128xf32>
    %105 = vector.broadcast %0 : vector<1x128xf32> to vector<8x128xf32>
    %106 = arith.mulf %104, %105 : vector<8x128xf32>
    %107 = vector.broadcast %1 : vector<1x128xf32> to vector<8x128xf32>
    %108 = arith.addf %106, %107 : vector<8x128xf32>
    %cst_36 = arith.constant 0.000000e+00 : f32
    %109 = vector.broadcast %cst_36 : f32 to vector<8x128xf32>
    %110 = arith.maximumf %108, %109 : vector<8x128xf32>
    %c97 = arith.constant 97 : index
    %c0_37 = arith.constant 0 : index
    %111 = tpu.strided_load %arg1[%c97, %c0_37] {strides = array<i32: 2, 1>} : memref<256x128xf32, #tpu.memory_space<vmem>>, vector<8x128xf32>
    %112 = vector.broadcast %0 : vector<1x128xf32> to vector<8x128xf32>
    %113 = arith.mulf %111, %112 : vector<8x128xf32>
    %114 = vector.broadcast %1 : vector<1x128xf32> to vector<8x128xf32>
    %115 = arith.addf %113, %114 : vector<8x128xf32>
    %cst_38 = arith.constant 0.000000e+00 : f32
    %116 = vector.broadcast %cst_38 : f32 to vector<8x128xf32>
    %117 = arith.maximumf %115, %116 : vector<8x128xf32>
    %c112 = arith.constant 112 : index
    %c0_39 = arith.constant 0 : index
    %118 = tpu.strided_load %arg1[%c112, %c0_39] {strides = array<i32: 2, 1>} : memref<256x128xf32, #tpu.memory_space<vmem>>, vector<8x128xf32>
    %119 = vector.broadcast %0 : vector<1x128xf32> to vector<8x128xf32>
    %120 = arith.mulf %118, %119 : vector<8x128xf32>
    %121 = vector.broadcast %1 : vector<1x128xf32> to vector<8x128xf32>
    %122 = arith.addf %120, %121 : vector<8x128xf32>
    %cst_40 = arith.constant 0.000000e+00 : f32
    %123 = vector.broadcast %cst_40 : f32 to vector<8x128xf32>
    %124 = arith.maximumf %122, %123 : vector<8x128xf32>
    %c113 = arith.constant 113 : index
    %c0_41 = arith.constant 0 : index
    %125 = tpu.strided_load %arg1[%c113, %c0_41] {strides = array<i32: 2, 1>} : memref<256x128xf32, #tpu.memory_space<vmem>>, vector<8x128xf32>
    %126 = vector.broadcast %0 : vector<1x128xf32> to vector<8x128xf32>
    %127 = arith.mulf %125, %126 : vector<8x128xf32>
    %128 = vector.broadcast %1 : vector<1x128xf32> to vector<8x128xf32>
    %129 = arith.addf %127, %128 : vector<8x128xf32>
    %cst_42 = arith.constant 0.000000e+00 : f32
    %130 = vector.broadcast %cst_42 : f32 to vector<8x128xf32>
    %131 = arith.maximumf %129, %130 : vector<8x128xf32>
    %132 = arith.addf %110, %117 : vector<8x128xf32>
    %133 = arith.addf %132, %124 : vector<8x128xf32>
    %134 = arith.addf %133, %131 : vector<8x128xf32>
    %cst_43 = arith.constant 2.500000e-01 : f32
    %135 = vector.broadcast %cst_43 : f32 to vector<8x128xf32>
    %136 = arith.mulf %134, %135 : vector<8x128xf32>
    %c24 = arith.constant 24 : index
    %c0_44 = arith.constant 0 : index
    %137 = vector.load %arg4[%c24, %c0_44] : memref<64x128xf32, #tpu.memory_space<vmem>>, vector<8x128xf32>
    tpu.vector_store %arg4[%c24, %c0_44], %136 {strides = array<i32>} : memref<64x128xf32, #tpu.memory_space<vmem>>, vector<8x128xf32>,
    %c128 = arith.constant 128 : index
    %c0_45 = arith.constant 0 : index
    %138 = tpu.strided_load %arg1[%c128, %c0_45] {strides = array<i32: 2, 1>} : memref<256x128xf32, #tpu.memory_space<vmem>>, vector<8x128xf32>
    %139 = vector.broadcast %0 : vector<1x128xf32> to vector<8x128xf32>
    %140 = arith.mulf %138, %139 : vector<8x128xf32>
    %141 = vector.broadcast %1 : vector<1x128xf32> to vector<8x128xf32>
    %142 = arith.addf %140, %141 : vector<8x128xf32>
    %cst_46 = arith.constant 0.000000e+00 : f32
    %143 = vector.broadcast %cst_46 : f32 to vector<8x128xf32>
    %144 = arith.maximumf %142, %143 : vector<8x128xf32>
    %c129 = arith.constant 129 : index
    %c0_47 = arith.constant 0 : index
    %145 = tpu.strided_load %arg1[%c129, %c0_47] {strides = array<i32: 2, 1>} : memref<256x128xf32, #tpu.memory_space<vmem>>, vector<8x128xf32>
    %146 = vector.broadcast %0 : vector<1x128xf32> to vector<8x128xf32>
    %147 = arith.mulf %145, %146 : vector<8x128xf32>
    %148 = vector.broadcast %1 : vector<1x128xf32> to vector<8x128xf32>
    %149 = arith.addf %147, %148 : vector<8x128xf32>
    %cst_48 = arith.constant 0.000000e+00 : f32
    %150 = vector.broadcast %cst_48 : f32 to vector<8x128xf32>
    %151 = arith.maximumf %149, %150 : vector<8x128xf32>
    %c144 = arith.constant 144 : index
    %c0_49 = arith.constant 0 : index
    %152 = tpu.strided_load %arg1[%c144, %c0_49] {strides = array<i32: 2, 1>} : memref<256x128xf32, #tpu.memory_space<vmem>>, vector<8x128xf32>
    %153 = vector.broadcast %0 : vector<1x128xf32> to vector<8x128xf32>
    %154 = arith.mulf %152, %153 : vector<8x128xf32>
    %155 = vector.broadcast %1 : vector<1x128xf32> to vector<8x128xf32>
    %156 = arith.addf %154, %155 : vector<8x128xf32>
    %cst_50 = arith.constant 0.000000e+00 : f32
    %157 = vector.broadcast %cst_50 : f32 to vector<8x128xf32>
    %158 = arith.maximumf %156, %157 : vector<8x128xf32>
    %c145 = arith.constant 145 : index
    %c0_51 = arith.constant 0 : index
    %159 = tpu.strided_load %arg1[%c145, %c0_51] {strides = array<i32: 2, 1>} : memref<256x128xf32, #tpu.memory_space<vmem>>, vector<8x128xf32>
    %160 = vector.broadcast %0 : vector<1x128xf32> to vector<8x128xf32>
    %161 = arith.mulf %159, %160 : vector<8x128xf32>
    %162 = vector.broadcast %1 : vector<1x128xf32> to vector<8x128xf32>
    %163 = arith.addf %161, %162 : vector<8x128xf32>
    %cst_52 = arith.constant 0.000000e+00 : f32
    %164 = vector.broadcast %cst_52 : f32 to vector<8x128xf32>
    %165 = arith.maximumf %163, %164 : vector<8x128xf32>
    %166 = arith.addf %144, %151 : vector<8x128xf32>
    %167 = arith.addf %166, %158 : vector<8x128xf32>
    %168 = arith.addf %167, %165 : vector<8x128xf32>
    %cst_53 = arith.constant 2.500000e-01 : f32
    %169 = vector.broadcast %cst_53 : f32 to vector<8x128xf32>
    %170 = arith.mulf %168, %169 : vector<8x128xf32>
    %c32_54 = arith.constant 32 : index
    %c0_55 = arith.constant 0 : index
    %171 = vector.load %arg4[%c32_54, %c0_55] : memref<64x128xf32, #tpu.memory_space<vmem>>, vector<8x128xf32>
    tpu.vector_store %arg4[%c32_54, %c0_55], %170 {strides = array<i32>} : memref<64x128xf32, #tpu.memory_space<vmem>>, vector<8x128xf32>,
    %c160 = arith.constant 160 : index
    %c0_56 = arith.constant 0 : index
    %172 = tpu.strided_load %arg1[%c160, %c0_56] {strides = array<i32: 2, 1>} : memref<256x128xf32, #tpu.memory_space<vmem>>, vector<8x128xf32>
    %173 = vector.broadcast %0 : vector<1x128xf32> to vector<8x128xf32>
    %174 = arith.mulf %172, %173 : vector<8x128xf32>
    %175 = vector.broadcast %1 : vector<1x128xf32> to vector<8x128xf32>
    %176 = arith.addf %174, %175 : vector<8x128xf32>
    %cst_57 = arith.constant 0.000000e+00 : f32
    %177 = vector.broadcast %cst_57 : f32 to vector<8x128xf32>
    %178 = arith.maximumf %176, %177 : vector<8x128xf32>
    %c161 = arith.constant 161 : index
    %c0_58 = arith.constant 0 : index
    %179 = tpu.strided_load %arg1[%c161, %c0_58] {strides = array<i32: 2, 1>} : memref<256x128xf32, #tpu.memory_space<vmem>>, vector<8x128xf32>
    %180 = vector.broadcast %0 : vector<1x128xf32> to vector<8x128xf32>
    %181 = arith.mulf %179, %180 : vector<8x128xf32>
    %182 = vector.broadcast %1 : vector<1x128xf32> to vector<8x128xf32>
    %183 = arith.addf %181, %182 : vector<8x128xf32>
    %cst_59 = arith.constant 0.000000e+00 : f32
    %184 = vector.broadcast %cst_59 : f32 to vector<8x128xf32>
    %185 = arith.maximumf %183, %184 : vector<8x128xf32>
    %c176 = arith.constant 176 : index
    %c0_60 = arith.constant 0 : index
    %186 = tpu.strided_load %arg1[%c176, %c0_60] {strides = array<i32: 2, 1>} : memref<256x128xf32, #tpu.memory_space<vmem>>, vector<8x128xf32>
    %187 = vector.broadcast %0 : vector<1x128xf32> to vector<8x128xf32>
    %188 = arith.mulf %186, %187 : vector<8x128xf32>
    %189 = vector.broadcast %1 : vector<1x128xf32> to vector<8x128xf32>
    %190 = arith.addf %188, %189 : vector<8x128xf32>
    %cst_61 = arith.constant 0.000000e+00 : f32
    %191 = vector.broadcast %cst_61 : f32 to vector<8x128xf32>
    %192 = arith.maximumf %190, %191 : vector<8x128xf32>
    %c177 = arith.constant 177 : index
    %c0_62 = arith.constant 0 : index
    %193 = tpu.strided_load %arg1[%c177, %c0_62] {strides = array<i32: 2, 1>} : memref<256x128xf32, #tpu.memory_space<vmem>>, vector<8x128xf32>
    %194 = vector.broadcast %0 : vector<1x128xf32> to vector<8x128xf32>
    %195 = arith.mulf %193, %194 : vector<8x128xf32>
    %196 = vector.broadcast %1 : vector<1x128xf32> to vector<8x128xf32>
    %197 = arith.addf %195, %196 : vector<8x128xf32>
    %cst_63 = arith.constant 0.000000e+00 : f32
    %198 = vector.broadcast %cst_63 : f32 to vector<8x128xf32>
    %199 = arith.maximumf %197, %198 : vector<8x128xf32>
    %200 = arith.addf %178, %185 : vector<8x128xf32>
    %201 = arith.addf %200, %192 : vector<8x128xf32>
    %202 = arith.addf %201, %199 : vector<8x128xf32>
    %cst_64 = arith.constant 2.500000e-01 : f32
    %203 = vector.broadcast %cst_64 : f32 to vector<8x128xf32>
    %204 = arith.mulf %202, %203 : vector<8x128xf32>
    %c40 = arith.constant 40 : index
    %c0_65 = arith.constant 0 : index
    %205 = vector.load %arg4[%c40, %c0_65] : memref<64x128xf32, #tpu.memory_space<vmem>>, vector<8x128xf32>
    tpu.vector_store %arg4[%c40, %c0_65], %204 {strides = array<i32>} : memref<64x128xf32, #tpu.memory_space<vmem>>, vector<8x128xf32>,
    %c192 = arith.constant 192 : index
    %c0_66 = arith.constant 0 : index
    %206 = tpu.strided_load %arg1[%c192, %c0_66] {strides = array<i32: 2, 1>} : memref<256x128xf32, #tpu.memory_space<vmem>>, vector<8x128xf32>
    %207 = vector.broadcast %0 : vector<1x128xf32> to vector<8x128xf32>
    %208 = arith.mulf %206, %207 : vector<8x128xf32>
    %209 = vector.broadcast %1 : vector<1x128xf32> to vector<8x128xf32>
    %210 = arith.addf %208, %209 : vector<8x128xf32>
    %cst_67 = arith.constant 0.000000e+00 : f32
    %211 = vector.broadcast %cst_67 : f32 to vector<8x128xf32>
    %212 = arith.maximumf %210, %211 : vector<8x128xf32>
    %c193 = arith.constant 193 : index
    %c0_68 = arith.constant 0 : index
    %213 = tpu.strided_load %arg1[%c193, %c0_68] {strides = array<i32: 2, 1>} : memref<256x128xf32, #tpu.memory_space<vmem>>, vector<8x128xf32>
    %214 = vector.broadcast %0 : vector<1x128xf32> to vector<8x128xf32>
    %215 = arith.mulf %213, %214 : vector<8x128xf32>
    %216 = vector.broadcast %1 : vector<1x128xf32> to vector<8x128xf32>
    %217 = arith.addf %215, %216 : vector<8x128xf32>
    %cst_69 = arith.constant 0.000000e+00 : f32
    %218 = vector.broadcast %cst_69 : f32 to vector<8x128xf32>
    %219 = arith.maximumf %217, %218 : vector<8x128xf32>
    %c208 = arith.constant 208 : index
    %c0_70 = arith.constant 0 : index
    %220 = tpu.strided_load %arg1[%c208, %c0_70] {strides = array<i32: 2, 1>} : memref<256x128xf32, #tpu.memory_space<vmem>>, vector<8x128xf32>
    %221 = vector.broadcast %0 : vector<1x128xf32> to vector<8x128xf32>
    %222 = arith.mulf %220, %221 : vector<8x128xf32>
    %223 = vector.broadcast %1 : vector<1x128xf32> to vector<8x128xf32>
    %224 = arith.addf %222, %223 : vector<8x128xf32>
    %cst_71 = arith.constant 0.000000e+00 : f32
    %225 = vector.broadcast %cst_71 : f32 to vector<8x128xf32>
    %226 = arith.maximumf %224, %225 : vector<8x128xf32>
    %c209 = arith.constant 209 : index
    %c0_72 = arith.constant 0 : index
    %227 = tpu.strided_load %arg1[%c209, %c0_72] {strides = array<i32: 2, 1>} : memref<256x128xf32, #tpu.memory_space<vmem>>, vector<8x128xf32>
    %228 = vector.broadcast %0 : vector<1x128xf32> to vector<8x128xf32>
    %229 = arith.mulf %227, %228 : vector<8x128xf32>
    %230 = vector.broadcast %1 : vector<1x128xf32> to vector<8x128xf32>
    %231 = arith.addf %229, %230 : vector<8x128xf32>
    %cst_73 = arith.constant 0.000000e+00 : f32
    %232 = vector.broadcast %cst_73 : f32 to vector<8x128xf32>
    %233 = arith.maximumf %231, %232 : vector<8x128xf32>
    %234 = arith.addf %212, %219 : vector<8x128xf32>
    %235 = arith.addf %234, %226 : vector<8x128xf32>
    %236 = arith.addf %235, %233 : vector<8x128xf32>
    %cst_74 = arith.constant 2.500000e-01 : f32
    %237 = vector.broadcast %cst_74 : f32 to vector<8x128xf32>
    %238 = arith.mulf %236, %237 : vector<8x128xf32>
    %c48_75 = arith.constant 48 : index
    %c0_76 = arith.constant 0 : index
    %239 = vector.load %arg4[%c48_75, %c0_76] : memref<64x128xf32, #tpu.memory_space<vmem>>, vector<8x128xf32>
    tpu.vector_store %arg4[%c48_75, %c0_76], %238 {strides = array<i32>} : memref<64x128xf32, #tpu.memory_space<vmem>>, vector<8x128xf32>,
    %c224 = arith.constant 224 : index
    %c0_77 = arith.constant 0 : index
    %240 = tpu.strided_load %arg1[%c224, %c0_77] {strides = array<i32: 2, 1>} : memref<256x128xf32, #tpu.memory_space<vmem>>, vector<8x128xf32>
    %241 = vector.broadcast %0 : vector<1x128xf32> to vector<8x128xf32>
    %242 = arith.mulf %240, %241 : vector<8x128xf32>
    %243 = vector.broadcast %1 : vector<1x128xf32> to vector<8x128xf32>
    %244 = arith.addf %242, %243 : vector<8x128xf32>
    %cst_78 = arith.constant 0.000000e+00 : f32
    %245 = vector.broadcast %cst_78 : f32 to vector<8x128xf32>
    %246 = arith.maximumf %244, %245 : vector<8x128xf32>
    %c225 = arith.constant 225 : index
    %c0_79 = arith.constant 0 : index
    %247 = tpu.strided_load %arg1[%c225, %c0_79] {strides = array<i32: 2, 1>} : memref<256x128xf32, #tpu.memory_space<vmem>>, vector<8x128xf32>
    %248 = vector.broadcast %0 : vector<1x128xf32> to vector<8x128xf32>
    %249 = arith.mulf %247, %248 : vector<8x128xf32>
    %250 = vector.broadcast %1 : vector<1x128xf32> to vector<8x128xf32>
    %251 = arith.addf %249, %250 : vector<8x128xf32>
    %cst_80 = arith.constant 0.000000e+00 : f32
    %252 = vector.broadcast %cst_80 : f32 to vector<8x128xf32>
    %253 = arith.maximumf %251, %252 : vector<8x128xf32>
    %c240 = arith.constant 240 : index
    %c0_81 = arith.constant 0 : index
    %254 = tpu.strided_load %arg1[%c240, %c0_81] {strides = array<i32: 2, 1>} : memref<256x128xf32, #tpu.memory_space<vmem>>, vector<8x128xf32>
    %255 = vector.broadcast %0 : vector<1x128xf32> to vector<8x128xf32>
    %256 = arith.mulf %254, %255 : vector<8x128xf32>
    %257 = vector.broadcast %1 : vector<1x128xf32> to vector<8x128xf32>
    %258 = arith.addf %256, %257 : vector<8x128xf32>
    %cst_82 = arith.constant 0.000000e+00 : f32
    %259 = vector.broadcast %cst_82 : f32 to vector<8x128xf32>
    %260 = arith.maximumf %258, %259 : vector<8x128xf32>
    %c241 = arith.constant 241 : index
    %c0_83 = arith.constant 0 : index
    %261 = tpu.strided_load %arg1[%c241, %c0_83] {strides = array<i32: 2, 1>} : memref<256x128xf32, #tpu.memory_space<vmem>>, vector<8x128xf32>
    %262 = vector.broadcast %0 : vector<1x128xf32> to vector<8x128xf32>
    %263 = arith.mulf %261, %262 : vector<8x128xf32>
    %264 = vector.broadcast %1 : vector<1x128xf32> to vector<8x128xf32>
    %265 = arith.addf %263, %264 : vector<8x128xf32>
    %cst_84 = arith.constant 0.000000e+00 : f32
    %266 = vector.broadcast %cst_84 : f32 to vector<8x128xf32>
    %267 = arith.maximumf %265, %266 : vector<8x128xf32>
    %268 = arith.addf %246, %253 : vector<8x128xf32>
    %269 = arith.addf %268, %260 : vector<8x128xf32>
    %270 = arith.addf %269, %267 : vector<8x128xf32>
    %cst_85 = arith.constant 2.500000e-01 : f32
    %271 = vector.broadcast %cst_85 : f32 to vector<8x128xf32>
    %272 = arith.mulf %270, %271 : vector<8x128xf32>
    %c56 = arith.constant 56 : index
    %c0_86 = arith.constant 0 : index
    %273 = vector.load %arg4[%c56, %c0_86] : memref<64x128xf32, #tpu.memory_space<vmem>>, vector<8x128xf32>
    tpu.vector_store %arg4[%c56, %c0_86], %272 {strides = array<i32>} : memref<64x128xf32, #tpu.memory_space<vmem>>, vector<8x128xf32>,
    return
  }
  func.func @transform_0(%arg0: i32) -> (i32, i32) {
    %c0_i32 = arith.constant 0 : i32
    %c0_i32_0 = arith.constant 0 : i32
    return %arg0, %c0_i32 : i32, i32
  }
  func.func @transform_1(%arg0: i32) -> (i32, i32) {
    %c0_i32 = arith.constant 0 : i32
    %c0_i32_0 = arith.constant 0 : i32
    %c0_i32_1 = arith.constant 0 : i32
    return %c0_i32, %c0_i32_0 : i32, i32
  }
  func.func @transform_2(%arg0: i32) -> (i32, i32) {
    %c0_i32 = arith.constant 0 : i32
    %c0_i32_0 = arith.constant 0 : i32
    %c0_i32_1 = arith.constant 0 : i32
    return %c0_i32, %c0_i32_0 : i32, i32
  }
  func.func @transform_3(%arg0: i32) -> (i32, i32) {
    %c0_i32 = arith.constant 0 : i32
    %c0_i32_0 = arith.constant 0 : i32
    return %arg0, %c0_i32 : i32, i32
  }
}

</mosaic_0001>

<bundles_post_ra>
// kernel: tile.13
= control target key start
LH: loop header
LB: loop body
LE: loop exit
PB: predicated region body
PF: predicated region fallthrough
CT: control target
= control target key end

     0   :  { %s22_s0 = inlined_call_operand.vmem [shape: f32[8], index: 0, kind: input, shape index: {}]   ;;  %s23_s1 = inlined_call_operand.vmem [shape: f32[3,8], index: 1, kind: output, shape index: {}]  }
   0x1   :  { %v4_v0 = vld [vmem:[%s22_s0] ss:$0 sm:$0xff] }
   0x2   :  { %5 = vst [vmem:[%s23_s1] sm:$0xf] %v4_v0 }

// kernel: conv_block_forward.3
= control target key start
LH: loop header
LB: loop body
LE: loop exit
PB: predicated region body
PF: predicated region fallthrough
CT: control target
= control target key end

     0   :  { %s1240_s12 = smov 0   ;;  %s1421_s0 = inlined_call_operand.vmem [shape: bf16[512,128], index: 0, kind: input, shape index: {}]   ;;  %s1422_s1 = inlined_call_operand.vmem [shape: bf16[128,128], index: 1, kind: input, shape index: {}]   ;;  %s1423_s2 = inlined_call_operand.vmem [shape: bf16[512,128], index: 2, kind: output, shape index: {0}]   ;;  %s1424_s3 = inlined_call_operand.vmem [shape: f32[16,128], index: 3, kind: output, shape index: {1}]  }
   0x1 LB: > { %s1246_s13 = sadd.s32 4294967295, %s1217_s12   ;;  %p899_p0 = scmp.ge.s32.totalorder %s1217_s12, 1  ;;  %s1217_s12 = sphi %s1240_s12, %s14_s12  }
   0x2   : > { %p141_p1 = scmp.lt.s32.totalorder %s1217_s12, 3 }
   0x4   : > { %p142_p2 = pnand %p899_p0, %p141_p1 }
   0x5   : > { %v1187_v0 = vld [vmem:[%s1422_s1] sm:$0xff] (!%p142_p2)   ;;  %s900_s16 = sshll.u32 (!%p142_p2), %s1246_s13, 5  ;;  %v1188_v1 = vld [vmem:[%s1422_s1 + $0x8] sm:$0xff] (!%p142_p2)   ;;  %v1189_v2 = vld [vmem:[%s1422_s1 + $0x10] sm:$0xff] (!%p142_p2)   ;;  %p181_p4 = scmp.lt.s32.totalorder (!%p142_p2), %s1246_s13, 1  ;;  %v1219_v24 = vmov (!%p142_p2), 0.0  }
   0x6   : > { %145 = sbr.rel (%p142_p2) target bundleno = 330 (0x14a), region = 28  ;;  %p170_p3 = scmp.lt.s32.totalorder (!%p142_p2), %s900_s16, 63  ;;  %1114 = vmatprep.subr.bf16.mxu0 (!%p142_p2), %v1187_v0  ;;  %1162 = vmatprep.subr.bf16.mxu1 (!%p142_p2), %v1187_v0  ;;  %v1190_v3 = vld [vmem:[%s1422_s1 + $0x18] sm:$0xff] (!%p142_p2)   ;;  %v1191_v5 = vld [vmem:[%s1422_s1 + $0x20] sm:$0xff] (!%p142_p2)   ;;  %v1192_v6 = vld [vmem:[%s1422_s1 + $0x28] sm:$0xff] (!%p142_p2)  }
   0x7   : > { %1115 = vmatpush3.bf16.msra.mxu0 (!%p142_p2), %v1187_v0  ;;  %1170 = vmatpush3.bf16.msra.mxu1 (!%p142_p2), %v1187_v0  ;;  %v1193_v8 = vld [vmem:[%s1422_s1 + $0x30] sm:$0xff] (!%p142_p2)   ;;  %v1194_v9 = vld [vmem:[%s1422_s1 + $0x38] sm:$0xff] (!%p142_p2)  }
   0x8   : > { %1116 = vmatprep.subr.bf16.mxu0 (!%p142_p2), %v1188_v1  ;;  %1163 = vmatprep.subr.bf16.mxu1 (!%p142_p2), %v1188_v1 }
   0xb   : > { %1117 = vmatpush3.bf16.msra.mxu0 (!%p142_p2), %v1188_v1  ;;  %1171 = vmatpush3.bf16.msra.mxu1 (!%p142_p2), %v1188_v1 }
   0xc   : > { %1118 = vmatprep.subr.bf16.mxu0 (!%p142_p2), %v1189_v2  ;;  %1164 = vmatprep.subr.bf16.mxu1 (!%p142_p2), %v1189_v2 }
   0xd   : > { %s1426_s16 = smov (!%p170_p3, %s900_s16), 63  ;;  %s1428_s13 = smov (!%p181_p4, %s1246_s13), 1 }
   0xe   : > { %s901_s21 = sshll.u32 %s1426_s16, 2  ;;  %s904_s8 = sshll.u32 %s1428_s13, 3 }
   0xf   : > { %s1268_s24 = scalar_lea.vmem %s1421_s0, %s901_s21  ;;  %1119 = vmatpush3.bf16.msra.mxu0 %v1189_v2  ;;  %1172 = vmatpush3.bf16.msra.mxu1 %v1189_v2  ;;  %s1306_s11 = scalar_lea.vmem %s1424_s3, %s904_s8 }
  0x10   : > { %v1195_v4 = vld [vmem:[%s1268_s24] sm:$0xff]   ;;  %1120 = vmatprep.subr.bf16.mxu0 %v1190_v3  ;;  %1165 = vmatprep.subr.bf16.mxu1 %v1190_v3  ;;  %v1196_v10 = vld [vmem:[%s1268_s24 + $0x8] sm:$0xff]   ;;  %v1197_v12 = vld [vmem:[%s1268_s24 + $0x10] sm:$0xff]   ;;  %807 = vst [vmem:[%s1306_s11 + $0x2] sm:$0x3f] %v1219_v24  ;;  %s1318_s17 = scalar_lea.vmem %s1423_s2, %s901_s21 }
  0x11   : > { %1130 = vmatprep.mubr.bf16.mxu0 %v1195_v4  ;;  %v1203_v7 = vld [vmem:[%s1268_s24 + $0x40] sm:$0xff]   ;;  %v1204_v11 = vld [vmem:[%s1268_s24 + $0x48] sm:$0xff]   ;;  %v1205_v13 = vld [vmem:[%s1268_s24 + $0x50] sm:$0xff]  }
  0x12   : > { %1146 = vmatprep.mubr.bf16.mxu1 %v1203_v7  ;;  %v1198_v14 = vld [vmem:[%s1268_s24 + $0x18] sm:$0xff]   ;;  %v1199_v16 = vld [vmem:[%s1268_s24 + $0x20] sm:$0xff]   ;;  %v1200_v18 = vld [vmem:[%s1268_s24 + $0x28] sm:$0xff]  }
  0x13   : > { %1121 = vmatpush3.bf16.msra.mxu0 %v1190_v3  ;;  %1173 = vmatpush3.bf16.msra.mxu1 %v1190_v3  ;;  %v1206_v15 = vld [vmem:[%s1268_s24 + $0x58] sm:$0xff]   ;;  %v1207_v17 = vld [vmem:[%s1268_s24 + $0x60] sm:$0xff]   ;;  %v1208_v19 = vld [vmem:[%s1268_s24 + $0x68] sm:$0xff]  }
  0x14   : > { %1122 = vmatprep.subr.bf16.mxu0 %v1191_v5  ;;  %1166 = vmatprep.subr.bf16.mxu1 %v1191_v5  ;;  %v1201_v20 = vld [vmem:[%s1268_s24 + $0x30] sm:$0xff]   ;;  %v1202_v22 = vld [vmem:[%s1268_s24 + $0x38] sm:$0xff]  }
  0x15   : > { %v1209_v21 = vld [vmem:[%s1268_s24 + $0x70] sm:$0xff]   ;;  %v1210_v23 = vld [vmem:[%s1268_s24 + $0x78] sm:$0xff]  }
  0x17   : > { %1123 = vmatpush3.bf16.msra.mxu0 %v1191_v5  ;;  %1174 = vmatpush3.bf16.msra.mxu1 %v1191_v5 }
  0x18   : > { %1124 = vmatprep.subr.bf16.mxu0 %v1192_v6  ;;  %1167 = vmatprep.subr.bf16.mxu1 %v1192_v6 }
  0x1b   : > { %1125 = vmatpush3.bf16.msra.mxu0 %v1192_v6  ;;  %1175 = vmatpush3.bf16.msra.mxu1 %v1192_v6 }
  0x1c   : > { %1126 = vmatprep.subr.bf16.mxu0 %v1193_v8  ;;  %1168 = vmatprep.subr.bf16.mxu1 %v1193_v8 }
  0x1f   : > { %1127 = vmatpush3.bf16.msra.mxu0 %v1193_v8  ;;  %1176 = vmatpush3.bf16.msra.mxu1 %v1193_v8 }
  0x20   : > { %1128 = vmatprep.subr.bf16.mxu0 %v1194_v9  ;;  %1169 = vmatprep.subr.bf16.mxu1 %v1194_v9 }
  0x23   : > { %1129 = vmatpush3.bf16.msra.mxu0 %v1194_v9  ;;  %1177 = vmatpush3.bf16.msra.mxu1 %v1194_v9 }
  0x26   : > { %1131 = vmatmul.mubr.bf16.vlgmr.msra.gmra.mrb[0].mxu0 %v1196_v10  ;;  %1147 = vmatmul.mubr.bf16.vlgmr.msra.gmra.mrb[0].mxu1 %v1204_v11 }
  0x27   : > { %1134 = vmatprep.mubr.bf16.mxu0 %v1197_v12  ;;  %1150 = vmatprep.mubr.bf16.mxu1 %v1205_v13 }
  0x2e   : > { %1135 = vmatmul.mubr.bf16.gmra.mrb[4].mxu0 %v1198_v14  ;;  %1151 = vmatmul.mubr.bf16.gmra.mrb[4].mxu1 %v1206_v15 }
  0x2f   : > { %1138 = vmatprep.mubr.bf16.mxu0 %v1199_v16  ;;  %1154 = vmatprep.mubr.bf16.mxu1 %v1207_v17 }
  0x36   : > { %1139 = vmatmul.mubr.bf16.gmra.mrb[8].mxu0 %v1200_v18  ;;  %1155 = vmatmul.mubr.bf16.gmra.mrb[8].mxu1 %v1208_v19 }
  0x37   : > { %1142 = vmatprep.mubr.bf16.mxu0 %v1201_v20  ;;  %1158 = vmatprep.mubr.bf16.mxu1 %v1209_v21 }
  0x3e   : > { %1143 = vmatmul.mubr.bf16.gmra.mrb[12].mxu0 %v1202_v22  ;;  %1159 = vmatmul.mubr.bf16.gmra.mrb[12].mxu1 %v1210_v23 }
  0xf9   : > { %v1132_v25 = vpop.f32.mrb[0].mxu0  ;;  %v1309_v26 = vpop.f32.mrb[0].mxu1 }
  0xfa   : > { %v412_v27 = vpop.f32.mrb[1].mxu0  ;;  %v1311_v28 = vpop.f32.mrb[1].mxu1  ;;  %v739_v40 = vmul.f32 %v1132_v25, %v1132_v25 }
  0xfb   : > { %v1133_v29 = vpop.f32.mrb[2].mxu0  ;;  %v1320_v30 = vpop.f32.mrb[2].mxu1  ;;  %v737_v31 = vmul.f32 %v412_v27, %v412_v27 }
  0xfc   : > { %v1003_v32 = vpack.c.bf16 %v1133_v29, %v1132_v25  ;;  %v415_v33 = vpop.f32.mrb[3].mxu0  ;;  %v1043_v34 = vpack.c.bf16 %v1320_v30, %v1309_v26  ;;  %v1324_v35 = vpop.f32.mrb[3].mxu1  ;;  %v740_v43 = vmul.f32 %v1133_v29, %v1133_v29 }
  0xfd   : > { %v998_v36 = vpack.c.bf16 %v415_v33, %v412_v27  ;;  %v699_v37 = vadd.f32 %v415_v33, %v412_v27  ;;  %v738_v38 = vmul.f32 %v415_v33, %v415_v33  ;;  %v1038_v39 = vpack.c.bf16 %v1324_v35, %v1311_v28 }
  0xfe   : > { %1075 = vst [vmem:[%s1318_s17 + $0x8] sm:$0xff] %v1003_v32   ;;  %1083 = vst [vmem:[%s1318_s17 + $0x48] sm:$0xff] %v1043_v34  }
  0xff   : > { %999 = vst [vmem:[%s1318_s17] sm:$0xff] %v998_v36   ;;  %v700_v41 = vadd.f32 %v1132_v25, %v699_v37  ;;  %v769_v42 = vadd.f32 %v738_v38, %v737_v31  ;;  %1082 = vst [vmem:[%s1318_s17 + $0x40] sm:$0xff] %v1038_v39  }
 0x101   : > { %v770_v44 = vadd.f32 %v769_v42, %v739_v40  ;;  %v1136_v45 = vpop.f32.mrb[4].mxu0  ;;  %v701_v46 = vadd.f32 %v1133_v29, %v700_v41  ;;  %v1332_v47 = vpop.f32.mrb[4].mxu1 }
 0x102   : > { %v428_v48 = vpop.f32.mrb[5].mxu0  ;;  %v1334_v49 = vpop.f32.mrb[5].mxu1  ;;  %v743_v0 = vmul.f32 %v1136_v45, %v1136_v45 }
 0x103   : > { %v702_v50 = vadd.f32 %v701_v46, %v428_v48  ;;  %v741_v51 = vmul.f32 %v428_v48, %v428_v48  ;;  %v771_v52 = vadd.f32 %v770_v44, %v740_v43  ;;  %v1137_v53 = vpop.f32.mrb[6].mxu0  ;;  %v1336_v54 = vpop.f32.mrb[6].mxu1 }
 0x104   : > { %v1013_v55 = vpack.c.bf16 %v1137_v53, %v1136_v45  ;;  %v431_v56 = vpop.f32.mrb[7].mxu0  ;;  %v1053_v57 = vpack.c.bf16 %v1336_v54, %v1332_v47  ;;  %v1340_v58 = vpop.f32.mrb[7].mxu1  ;;  %v744_v3 = vmul.f32 %v1137_v53, %v1137_v53 }
 0x105   : > { %v772_v59 = vadd.f32 %v771_v52, %v741_v51  ;;  %v1008_v60 = vpack.c.bf16 %v431_v56, %v428_v48  ;;  %v703_v61 = vadd.f32 %v702_v50, %v431_v56  ;;  %v742_v62 = vmul.f32 %v431_v56, %v431_v56 }
 0x106   : > { %1077 = vst [vmem:[%s1318_s17 + $0x18] sm:$0xff] %v1013_v55   ;;  %1085 = vst [vmem:[%s1318_s17 + $0x58] sm:$0xff] %v1053_v57   ;;  %v1048_v63 = vpack.c.bf16 %v1340_v58, %v1334_v49 }
 0x107   : > { %1076 = vst [vmem:[%s1318_s17 + $0x10] sm:$0xff] %v1008_v60   ;;  %v704_v1 = vadd.f32 %v1136_v45, %v703_v61  ;;  %v773_v2 = vadd.f32 %v772_v59, %v742_v62  ;;  %v753_v62 = vmul.f32 %v1311_v28, %v1311_v28 }
 0x108   : > { %1084 = vst [vmem:[%s1318_s17 + $0x50] sm:$0xff] %v1048_v63  }
 0x109   : > { %v774_v4 = vadd.f32 %v773_v2, %v743_v0  ;;  %v1140_v5 = vpop.f32.mrb[8].mxu0  ;;  %v705_v6 = vadd.f32 %v1137_v53, %v704_v1  ;;  %v1348_v7 = vpop.f32.mrb[8].mxu1 }
 0x10a   : > { %v444_v8 = vpop.f32.mrb[9].mxu0  ;;  %v1350_v9 = vpop.f32.mrb[9].mxu1  ;;  %v747_v24 = vmul.f32 %v1140_v5, %v1140_v5 }
 0x10b   : > { %v706_v10 = vadd.f32 %v705_v6, %v444_v8  ;;  %v745_v11 = vmul.f32 %v444_v8, %v444_v8  ;;  %v775_v12 = vadd.f32 %v774_v4, %v744_v3  ;;  %v1141_v13 = vpop.f32.mrb[10].mxu0  ;;  %v1352_v14 = vpop.f32.mrb[10].mxu1  ;;  %v754_v3 = vmul.f32 %v1324_v35, %v1324_v35 }
 0x10c   : > { %v1023_v15 = vpack.c.bf16 %v1141_v13, %v1140_v5  ;;  %v447_v16 = vpop.f32.mrb[11].mxu0  ;;  %v1063_v17 = vpack.c.bf16 %v1352_v14, %v1348_v7  ;;  %v1356_v18 = vpop.f32.mrb[11].mxu1  ;;  %v748_v29 = vmul.f32 %v1141_v13, %v1141_v13  ;;  %v755_v4 = vmul.f32 %v1309_v26, %v1309_v26 }
 0x10d   : > { %v776_v19 = vadd.f32 %v775_v12, %v745_v11  ;;  %v1018_v20 = vpack.c.bf16 %v447_v16, %v444_v8  ;;  %v707_v21 = vadd.f32 %v706_v10, %v447_v16  ;;  %v746_v22 = vmul.f32 %v447_v16, %v447_v16 }
 0x10e   : > { %1079 = vst [vmem:[%s1318_s17 + $0x28] sm:$0xff] %v1023_v15   ;;  %1087 = vst [vmem:[%s1318_s17 + $0x68] sm:$0xff] %v1063_v17   ;;  %v1058_v23 = vpack.c.bf16 %v1356_v18, %v1350_v9  ;;  %v756_v8 = vmul.f32 %v1320_v30, %v1320_v30  ;;  %v758_v16 = vmul.f32 %v1340_v58, %v1340_v58 }
 0x10f   : > { %1078 = vst [vmem:[%s1318_s17 + $0x20] sm:$0xff] %v1018_v20   ;;  %v708_v25 = vadd.f32 %v1140_v5, %v707_v21  ;;  %v777_v27 = vadd.f32 %v776_v19, %v746_v22 }
 0x110   : > { %1086 = vst [vmem:[%s1318_s17 + $0x60] sm:$0xff] %v1058_v23  }
 0x111   : > { %v778_v31 = vadd.f32 %v777_v27, %v747_v24  ;;  %v1144_v32 = vpop.f32.mrb[12].mxu0  ;;  %v709_v33 = vadd.f32 %v1141_v13, %v708_v25  ;;  %v1364_v34 = vpop.f32.mrb[12].mxu1  ;;  %v762_v25 = vmul.f32 %v1356_v18, %v1356_v18 }
 0x112   : > { %v460_v36 = vpop.f32.mrb[13].mxu0  ;;  %v524_v37 = vpop.f32.mrb[13].mxu1  ;;  %v751_v55 = vmul.f32 %v1144_v32, %v1144_v32 }
 0x113   : > { %v710_v38 = vadd.f32 %v709_v33, %v460_v36  ;;  %v749_v39 = vmul.f32 %v460_v36, %v460_v36  ;;  %v779_v40 = vadd.f32 %v778_v31, %v748_v29  ;;  %v1145_v41 = vpop.f32.mrb[14].mxu0  ;;  %v1366_v42 = vpop.f32.mrb[14].mxu1 }
 0x114   : > { %v1033_v43 = vpack.c.bf16 %v1145_v41, %v1144_v32  ;;  %v463_v44 = vpop.f32.mrb[15].mxu0  ;;  %v1073_v45 = vpack.c.bf16 %v1366_v42, %v1364_v34  ;;  %v527_v46 = vpop.f32.mrb[15].mxu1  ;;  %v752_v59 = vmul.f32 %v1145_v41, %v1145_v41 }
 0x115   : > { %v780_v48 = vadd.f32 %v779_v40, %v749_v39  ;;  %v1028_v50 = vpack.c.bf16 %v463_v44, %v460_v36  ;;  %v711_v51 = vadd.f32 %v710_v38, %v463_v44  ;;  %v750_v52 = vmul.f32 %v463_v44, %v463_v44 }
 0x116   : > { %1081 = vst [vmem:[%s1318_s17 + $0x38] sm:$0xff] %v1033_v43   ;;  %1089 = vst [vmem:[%s1318_s17 + $0x78] sm:$0xff] %v1073_v45   ;;  %v1068_v53 = vpack.c.bf16 %v527_v46, %v524_v37  ;;  %v766_v40 = vmul.f32 %v527_v46, %v527_v46 }
 0x117   : > { %1080 = vst [vmem:[%s1318_s17 + $0x30] sm:$0xff] %v1028_v50   ;;  %v712_v56 = vadd.f32 %v1144_v32, %v711_v51  ;;  %v781_v57 = vadd.f32 %v780_v48, %v750_v52 }
 0x118   : > { %1088 = vst [vmem:[%s1318_s17 + $0x70] sm:$0xff] %v1068_v53  }
 0x119   : > { %v782_v60 = vadd.f32 %v781_v57, %v751_v55  ;;  %v713_v61 = vadd.f32 %v1145_v41, %v712_v56 }
 0x11b   : > { %v714_v63 = vadd.f32 %v713_v61, %v1311_v28  ;;  %v783_v0 = vadd.f32 %v782_v60, %v752_v59  ;;  %v757_v28 = vmul.f32 %v1334_v49, %v1334_v49 }
 0x11d   : > { %v784_v1 = vadd.f32 %v783_v0, %v753_v62  ;;  %v715_v2 = vadd.f32 %v714_v63, %v1324_v35 }
 0x11f   : > { %v716_v5 = vadd.f32 %v1309_v26, %v715_v2  ;;  %v785_v6 = vadd.f32 %v784_v1, %v754_v3  ;;  %v759_v26 = vmul.f32 %v1332_v47, %v1332_v47 }
 0x121   : > { %v786_v10 = vadd.f32 %v785_v6, %v755_v4  ;;  %v717_v11 = vadd.f32 %v1320_v30, %v716_v5  ;;  %v760_v30 = vmul.f32 %v1336_v54, %v1336_v54 }
 0x123   : > { %v718_v12 = vadd.f32 %v717_v11, %v1334_v49  ;;  %v787_v13 = vadd.f32 %v786_v10, %v756_v8  ;;  %v761_v49 = vmul.f32 %v1350_v9, %v1350_v9 }
 0x125   : > { %v788_v15 = vadd.f32 %v787_v13, %v757_v28  ;;  %v719_v35 = vadd.f32 %v718_v12, %v1340_v58 }
 0x127   : > { %v720_v17 = vadd.f32 %v1332_v47, %v719_v35  ;;  %v789_v19 = vadd.f32 %v788_v15, %v758_v16  ;;  %v763_v47 = vmul.f32 %v1348_v7, %v1348_v7 }
 0x129   : > { %v790_v20 = vadd.f32 %v789_v19, %v759_v26  ;;  %v721_v21 = vadd.f32 %v1336_v54, %v720_v17  ;;  %v764_v54 = vmul.f32 %v1352_v14, %v1352_v14 }
 0x12b   : > { %v722_v22 = vadd.f32 %v721_v21, %v1350_v9  ;;  %v791_v23 = vadd.f32 %v790_v20, %v760_v30  ;;  %v765_v9 = vmul.f32 %v524_v37, %v524_v37 }
 0x12d   : > { %v792_v24 = vadd.f32 %v791_v23, %v761_v49  ;;  %v723_v58 = vadd.f32 %v722_v22, %v1356_v18  ;;  %v767_v18 = vmul.f32 %v1364_v34, %v1364_v34 }
 0x12f   : > { %v724_v27 = vadd.f32 %v1348_v7, %v723_v58  ;;  %v793_v29 = vadd.f32 %v792_v24, %v762_v25  ;;  %v768_v7 = vmul.f32 %v1366_v42, %v1366_v42 }
 0x131   : > { %v794_v31 = vadd.f32 %v793_v29, %v763_v47  ;;  %v725_v32 = vadd.f32 %v1352_v14, %v724_v27 }
 0x133   : > { %v726_v33 = vadd.f32 %v725_v32, %v524_v37  ;;  %v795_v36 = vadd.f32 %v794_v31, %v764_v54 }
 0x135   : > { %v796_v38 = vadd.f32 %v795_v36, %v765_v9  ;;  %v727_v39 = vadd.f32 %v726_v33, %v527_v46 }
 0x137   : > { %v728_v41 = vadd.f32 %v1364_v34, %v727_v39  ;;  %v797_v43 = vadd.f32 %v796_v38, %v766_v40 }
 0x139   : > { %v729_v44 = vadd.f32 %v1366_v42, %v728_v41  ;;  %v798_v14 = vadd.f32 %v797_v43, %v767_v18 }
 0x13b   : > { %v730_v45 = vrot.slane %v729_v44, 4  ;;  %v799_v37 = vadd.f32 %v798_v14, %v768_v7 }
 0x13d   : > { %v731_v48 = vadd.f32 %v730_v45, %v729_v44  ;;  %v800_v50 = vrot.slane %v799_v37, 4 }
 0x13f   : > { %v732_v51 = vrot.slane %v731_v48, 2  ;;  %v801_v46 = vadd.f32 %v800_v50, %v799_v37 }
 0x141   : > { %v733_v52 = vadd.f32 %v732_v51, %v731_v48  ;;  %v802_v53 = vrot.slane %v801_v46, 2 }
 0x143   : > { %v734_v55 = vrot.slane %v733_v52, 1  ;;  %v803_v56 = vadd.f32 %v802_v53, %v801_v46 }
 0x145   : > { %v735_v34 = vadd.f32 %v734_v55, %v733_v52  ;;  %v804_v57 = vrot.slane %v803_v56, 1 }
 0x147   : > { %736 = vst [vmem:[%s1306_s11] sm:$0x1] %v735_v34  ;;  %v805_v59 = vadd.f32 %v804_v57, %v803_v56 }
 0x149   : > { %806 = vst [vmem:[%s1306_s11 + $0x1] sm:$0x1] %v805_v59 }
 0x14a PF: > { %s14_s12 = sadd.s32 1, %s1217_s12  }
 0x14b   : > { %p11_p5 = scmp.ge.s32.totalorder %s14_s12, 4  }
 0x14d   :  { %13 = sbr.rel (!%p11_p5) target bundleno = 1 (0x1), region = 70 }

// kernel: conv_block_forward.5
= control target key start
LH: loop header
LB: loop body
LE: loop exit
PB: predicated region body
PF: predicated region fallthrough
CT: control target
= control target key end

     0   :  { %s523_s12 = smov 0   ;;  %s667_s0 = inlined_call_operand.vmem [shape: f32[512,128], index: 0, kind: input, shape index: {}]   ;;  %s668_s1 = inlined_call_operand.vmem [shape: f32[1,128], index: 1, kind: input, shape index: {}]   ;;  %s669_s2 = inlined_call_operand.vmem [shape: f32[1,128], index: 2, kind: input, shape index: {}]   ;;  %s670_s3 = inlined_call_operand.vmem [shape: f32[128,128], index: 3, kind: output, shape index: {}]  }
   0x1 LB: > { %s443_s13 = sadd.s32 4294967295, %s501_s12   ;;  %p447_p0 = scmp.ge.s32.totalorder %s501_s12, 1  ;;  %s501_s12 = sphi %s523_s12, %s13_s12  }
   0x2   : > { %p138_p1 = scmp.lt.s32.totalorder %s501_s12, 3 }
   0x4   : > { %p139_p2 = pnand %p447_p0, %p138_p1 }
   0x5   : > { %s448_s14 = sshll.u32 (!%p139_p2), %s443_s13, 5  ;;  %s531_s15 = sshll.u32 (!%p139_p2), %s443_s13, 3  ;;  %v536_v0 = vld [vmem:[%s668_s1] ss:$0 sm:$0xff] (!%p139_p2) }
   0x6   : > { %142 = sbr.rel (%p139_p2) target bundleno = 58 (0x3a), region = 32  ;;  %p163_p3 = scmp.lt.s32.totalorder (!%p139_p2), %s448_s14, 63  ;;  %v547_v1 = vld [vmem:[%s669_s2] ss:$0 sm:$0xff] (!%p139_p2) }
   0x7   : > { %p169_p4 = scmp.lt.s32.totalorder (!%p139_p2), %s531_s15, 15 }
   0xd   : > { %s672_s14 = smov (!%p163_p3, %s448_s14), 63  ;;  %s674_s15 = smov (!%p169_p4, %s531_s15), 15 }
   0xe   : > { %s449_s16 = sshll.u32 %s672_s14, 3  ;;  %s451_s24 = sshll.u32 %s674_s15, 3 }
   0xf   : > { %s541_s21 = scalar_lea.vmem %s667_s0, %s449_s16  ;;  %s602_s27 = scalar_lea.vmem %s670_s3, %s451_s24 }
  0x10   : > { %v176_v2 = vld [vmem:[%s541_s21] ss:$2 sm:$0xff]  ;;  %v454_v3 = vld [vmem:[%s541_s21 + $0x1] ss:$2 sm:$0xff]  ;;  %v455_v4 = vld [vmem:[%s541_s21 + $0x10] ss:$2 sm:$0xff] }
  0x11   : > { %v183_v5 = vmul.f32 %v536_v0, %v176_v2  ;;  %v194_v6 = vmul.f32 %v454_v3, %v536_v0  ;;  %v199_v7 = vmul.f32 %v455_v4, %v536_v0  ;;  %v456_v8 = vld [vmem:[%s541_s21 + $0x11] ss:$2 sm:$0xff]  ;;  %v457_v9 = vld [vmem:[%s541_s21 + $0x20] ss:$2 sm:$0xff]  ;;  %v458_v10 = vld [vmem:[%s541_s21 + $0x21] ss:$2 sm:$0xff] }
  0x12   : > { %v204_v11 = vmul.f32 %v456_v8, %v536_v0  ;;  %v214_v12 = vmul.f32 %v457_v9, %v536_v0  ;;  %v219_v13 = vmul.f32 %v458_v10, %v536_v0  ;;  %v459_v14 = vld [vmem:[%s541_s21 + $0x30] ss:$2 sm:$0xff]  ;;  %v460_v15 = vld [vmem:[%s541_s21 + $0x31] ss:$2 sm:$0xff]  ;;  %v461_v24 = vld [vmem:[%s541_s21 + $0x40] ss:$2 sm:$0xff] }
  0x13   : > { %v190_v16 = vadd.f32 %v547_v1, %v183_v5  ;;  %v195_v17 = vadd.f32 %v547_v1, %v194_v6  ;;  %v200_v18 = vadd.f32 %v547_v1, %v199_v7  ;;  %v224_v19 = vmul.f32 %v459_v14, %v536_v0  ;;  %v462_v25 = vld [vmem:[%s541_s21 + $0x41] ss:$2 sm:$0xff]  ;;  %v463_v26 = vld [vmem:[%s541_s21 + $0x50] ss:$2 sm:$0xff]  ;;  %v464_v31 = vld [vmem:[%s541_s21 + $0x51] ss:$2 sm:$0xff] }
  0x14   : > { %v205_v20 = vadd.f32 %v547_v1, %v204_v11  ;;  %v215_v21 = vadd.f32 %v547_v1, %v214_v12  ;;  %v220_v22 = vadd.f32 %v547_v1, %v219_v13  ;;  %v229_v23 = vmul.f32 %v460_v15, %v536_v0  ;;  %v465_v36 = vld [vmem:[%s541_s21 + $0x60] ss:$2 sm:$0xff]  ;;  %v466_v41 = vld [vmem:[%s541_s21 + $0x61] ss:$2 sm:$0xff]  ;;  %v467_v54 = vld [vmem:[%s541_s21 + $0x70] ss:$2 sm:$0xff] }
  0x15   : > { %v191_v27 = vmax.f32 %v190_v16, 0.0  ;;  %v196_v28 = vmax.f32 %v195_v17, 0.0  ;;  %v201_v29 = vmax.f32 %v200_v18, 0.0  ;;  %v225_v30 = vadd.f32 %v547_v1, %v224_v19  ;;  %v468_v59 = vld [vmem:[%s541_s21 + $0x71] ss:$2 sm:$0xff] }
  0x16   : > { %v206_v32 = vmax.f32 %v205_v20, 0.0  ;;  %v216_v33 = vmax.f32 %v215_v21, 0.0  ;;  %v221_v34 = vmax.f32 %v220_v22, 0.0  ;;  %v230_v35 = vadd.f32 %v547_v1, %v229_v23  ;;  %v469_v60 = vld [vmem:[%s541_s21 + $0x80] ss:$2 sm:$0xff] }
  0x17   : > { %v207_v37 = vadd.f32 %v196_v28, %v191_v27  ;;  %v226_v38 = vmax.f32 %v225_v30, 0.0  ;;  %v239_v39 = vmul.f32 %v461_v24, %v536_v0  ;;  %v244_v40 = vmul.f32 %v462_v25, %v536_v0  ;;  %v470_v3 = vld [vmem:[%s541_s21 + $0x81] ss:$2 sm:$0xff]  ;;  %v471_v4 = vld [vmem:[%s541_s21 + $0x90] ss:$2 sm:$0xff] }
  0x18   : > { %v231_v42 = vmax.f32 %v230_v35, 0.0  ;;  %v232_v43 = vadd.f32 %v221_v34, %v216_v33  ;;  %v249_v44 = vmul.f32 %v463_v26, %v536_v0  ;;  %v254_v45 = vmul.f32 %v464_v31, %v536_v0  ;;  %v472_v9 = vld [vmem:[%s541_s21 + $0x91] ss:$2 sm:$0xff]  ;;  %v473_v18 = vld [vmem:[%s541_s21 + $0xa0] ss:$2 sm:$0xff] }
  0x19   : > { %v208_v46 = vadd.f32 %v207_v37, %v201_v29  ;;  %v240_v47 = vadd.f32 %v547_v1, %v239_v39  ;;  %v245_v48 = vadd.f32 %v547_v1, %v244_v40  ;;  %v264_v49 = vmul.f32 %v465_v36, %v536_v0  ;;  %v474_v27 = vld [vmem:[%s541_s21 + $0xa1] ss:$2 sm:$0xff]  ;;  %v475_v28 = vld [vmem:[%s541_s21 + $0xb0] ss:$2 sm:$0xff]  ;;  %v476_v33 = vld [vmem:[%s541_s21 + $0xb1] ss:$2 sm:$0xff] }
  0x1a   : > { %v233_v50 = vadd.f32 %v232_v43, %v226_v38  ;;  %v250_v51 = vadd.f32 %v547_v1, %v249_v44  ;;  %v255_v52 = vadd.f32 %v547_v1, %v254_v45  ;;  %v269_v53 = vmul.f32 %v466_v41, %v536_v0  ;;  %v477_v34 = vld [vmem:[%s541_s21 + $0xc0] ss:$2 sm:$0xff]  ;;  %v478_v39 = vld [vmem:[%s541_s21 + $0xc1] ss:$2 sm:$0xff] }
  0x1b   : > { %v209_v55 = vadd.f32 %v208_v46, %v206_v32  ;;  %v241_v56 = vmax.f32 %v240_v47, 0.0  ;;  %v246_v57 = vmax.f32 %v245_v48, 0.0  ;;  %v265_v58 = vadd.f32 %v547_v1, %v264_v49  ;;  %v479_v48 = vld [vmem:[%s541_s21 + $0xd0] ss:$2 sm:$0xff] }
  0x1c   : > { %v234_v61 = vadd.f32 %v233_v50, %v231_v42  ;;  %v251_v62 = vmax.f32 %v250_v51, 0.0  ;;  %v256_v63 = vmax.f32 %v255_v52, 0.0  ;;  %v270_v2 = vadd.f32 %v547_v1, %v269_v53  ;;  %v480_v53 = vld [vmem:[%s541_s21 + $0xd1] ss:$2 sm:$0xff] }
  0x1d   : > { %v210_v5 = vmul.f32 0.25, %v209_v55  ;;  %v257_v6 = vadd.f32 %v246_v57, %v241_v56  ;;  %v266_v7 = vmax.f32 %v265_v58, 0.0  ;;  %v274_v8 = vmul.f32 %v467_v54, %v536_v0  ;;  %v481_v58 = vld [vmem:[%s541_s21 + $0xe0] ss:$2 sm:$0xff] }
  0x1e   : > { %v235_v10 = vmul.f32 0.25, %v234_v61  ;;  %v271_v11 = vmax.f32 %v270_v2, 0.0  ;;  %v279_v12 = vmul.f32 %v468_v59, %v536_v0  ;;  %v289_v13 = vmul.f32 %v469_v60, %v536_v0  ;;  %v483_v2 = vld [vmem:[%s541_s21 + $0xf0] ss:$2 sm:$0xff] }
  0x1f   : > { %211 = vst [vmem:[%s602_s27] sm:$0xff] %v210_v5  ;;  %v258_v14 = vadd.f32 %v257_v6, %v251_v62  ;;  %v275_v15 = vadd.f32 %v547_v1, %v274_v8  ;;  %v294_v16 = vmul.f32 %v470_v3, %v536_v0  ;;  %v299_v17 = vmul.f32 %v471_v4, %v536_v0 }
  0x20   : > { %236 = vst [vmem:[%s602_s27 + $0x8] sm:$0xff] %v235_v10  ;;  %v280_v19 = vadd.f32 %v547_v1, %v279_v12  ;;  %v282_v20 = vadd.f32 %v271_v11, %v266_v7  ;;  %v290_v21 = vadd.f32 %v547_v1, %v289_v13  ;;  %v304_v22 = vmul.f32 %v472_v9, %v536_v0  ;;  %v484_v11 = vld [vmem:[%s541_s21 + $0xf1] ss:$2 sm:$0xff] }
  0x21   : > { %v259_v23 = vadd.f32 %v258_v14, %v256_v63  ;;  %v276_v24 = vmax.f32 %v275_v15, 0.0  ;;  %v295_v25 = vadd.f32 %v547_v1, %v294_v16  ;;  %v300_v26 = vadd.f32 %v547_v1, %v299_v17  ;;  %v482_v63 = vld [vmem:[%s541_s21 + $0xe1] ss:$2 sm:$0xff] }
  0x22   : > { %v281_v29 = vmax.f32 %v280_v19, 0.0  ;;  %v291_v30 = vmax.f32 %v290_v21, 0.0  ;;  %v305_v31 = vadd.f32 %v547_v1, %v304_v22  ;;  %v314_v32 = vmul.f32 %v473_v18, %v536_v0 }
  0x23   : > { %v260_v35 = vmul.f32 0.25, %v259_v23  ;;  %v283_v36 = vadd.f32 %v282_v20, %v276_v24  ;;  %v296_v37 = vmax.f32 %v295_v25, 0.0  ;;  %v301_v38 = vmax.f32 %v300_v26, 0.0 }
  0x24   : > { %v306_v40 = vmax.f32 %v305_v31, 0.0  ;;  %v315_v41 = vadd.f32 %v547_v1, %v314_v32  ;;  %v319_v42 = vmul.f32 %v474_v27, %v536_v0  ;;  %v324_v43 = vmul.f32 %v475_v28, %v536_v0 }
  0x25   : > { %261 = vst [vmem:[%s602_s27 + $0x10] sm:$0xff] %v260_v35  ;;  %v284_v44 = vadd.f32 %v283_v36, %v281_v29  ;;  %v307_v45 = vadd.f32 %v296_v37, %v291_v30  ;;  %v329_v46 = vmul.f32 %v476_v33, %v536_v0  ;;  %v339_v47 = vmul.f32 %v477_v34, %v536_v0 }
  0x26   : > { %v316_v49 = vmax.f32 %v315_v41, 0.0  ;;  %v320_v50 = vadd.f32 %v547_v1, %v319_v42  ;;  %v325_v51 = vadd.f32 %v547_v1, %v324_v43  ;;  %v344_v52 = vmul.f32 %v478_v39, %v536_v0 }
  0x27   : > { %v285_v54 = vmul.f32 0.25, %v284_v44  ;;  %v308_v55 = vadd.f32 %v307_v45, %v301_v38  ;;  %v330_v56 = vadd.f32 %v547_v1, %v329_v46  ;;  %v340_v57 = vadd.f32 %v547_v1, %v339_v47 }
  0x28   : > { %v321_v59 = vmax.f32 %v320_v50, 0.0  ;;  %v326_v60 = vmax.f32 %v325_v51, 0.0  ;;  %v345_v61 = vadd.f32 %v547_v1, %v344_v52  ;;  %v349_v62 = vmul.f32 %v479_v48, %v536_v0 }
  0x29   : > { %286 = vst [vmem:[%s602_s27 + $0x18] sm:$0xff] %v285_v54  ;;  %v309_v3 = vadd.f32 %v308_v55, %v306_v40  ;;  %v331_v4 = vmax.f32 %v330_v56, 0.0  ;;  %v341_v5 = vmax.f32 %v340_v57, 0.0  ;;  %v354_v6 = vmul.f32 %v480_v53, %v536_v0 }
  0x2a   : > { %v332_v7 = vadd.f32 %v321_v59, %v316_v49  ;;  %v346_v8 = vmax.f32 %v345_v61, 0.0  ;;  %v350_v9 = vadd.f32 %v547_v1, %v349_v62  ;;  %v364_v10 = vmul.f32 %v481_v58, %v536_v0 }
  0x2b   : > { %v310_v12 = vmul.f32 0.25, %v309_v3  ;;  %v355_v13 = vadd.f32 %v547_v1, %v354_v6  ;;  %v369_v14 = vmul.f32 %v482_v63, %v536_v0  ;;  %v374_v15 = vmul.f32 %v483_v2, %v536_v0 }
  0x2c   : > { %v333_v16 = vadd.f32 %v332_v7, %v326_v60  ;;  %v351_v17 = vmax.f32 %v350_v9, 0.0  ;;  %v357_v18 = vadd.f32 %v346_v8, %v341_v5  ;;  %v365_v19 = vadd.f32 %v547_v1, %v364_v10 }
  0x2d   : > { %311 = vst [vmem:[%s602_s27 + $0x20] sm:$0xff] %v310_v12  ;;  %v356_v20 = vmax.f32 %v355_v13, 0.0  ;;  %v370_v21 = vadd.f32 %v547_v1, %v369_v14  ;;  %v375_v22 = vadd.f32 %v547_v1, %v374_v15  ;;  %v379_v23 = vmul.f32 %v484_v11, %v536_v0 }
  0x2e   : > { %v334_v24 = vadd.f32 %v333_v16, %v331_v4  ;;  %v358_v25 = vadd.f32 %v357_v18, %v351_v17  ;;  %v366_v26 = vmax.f32 %v365_v19, 0.0 }
  0x2f   : > { %v371_v27 = vmax.f32 %v370_v21, 0.0  ;;  %v376_v28 = vmax.f32 %v375_v22, 0.0  ;;  %v380_v29 = vadd.f32 %v547_v1, %v379_v23 }
  0x30   : > { %v335_v30 = vmul.f32 0.25, %v334_v24  ;;  %v359_v31 = vadd.f32 %v358_v25, %v356_v20 }
  0x31   : > { %v381_v32 = vmax.f32 %v380_v29, 0.0  ;;  %v382_v33 = vadd.f32 %v371_v27, %v366_v26 }
  0x32   : > { %336 = vst [vmem:[%s602_s27 + $0x28] sm:$0xff] %v335_v30  ;;  %v360_v34 = vmul.f32 0.25, %v359_v31 }
  0x33   : > { %v383_v35 = vadd.f32 %v382_v33, %v376_v28 }
  0x34   : > { %361 = vst [vmem:[%s602_s27 + $0x30] sm:$0xff] %v360_v34 }
  0x35   : > { %v384_v36 = vadd.f32 %v383_v35, %v381_v32 }
  0x37   : > { %v385_v37 = vmul.f32 0.25, %v384_v36 }
  0x39   : > { %386 = vst [vmem:[%s602_s27 + $0x38] sm:$0xff] %v385_v37 }
  0x3a PF: > { %s13_s12 = sadd.s32 1, %s501_s12  }
  0x3b   : > { %p10_p5 = scmp.ge.s32.totalorder %s13_s12, 4  }
  0x3d   :  { %12 = sbr.rel (!%p10_p5) target bundleno = 1 (0x1), region = 93 }

// kernel: conv_block_forward.4
= control target key start
LH: loop header
LB: loop body
LE: loop exit
PB: predicated region body
PF: predicated region fallthrough
CT: control target
= control target key end

     0   :  { %s2910_s18 = smov 0   ;;  %s3752_s0 = inlined_call_operand.vmem [shape: bf16[512,128], index: 0, kind: input, shape index: {}]   ;;  %s3753_s1 = inlined_call_operand.vmem [shape: f32[1,128], index: 1, kind: input, shape index: {}]   ;;  %s3754_s2 = inlined_call_operand.vmem [shape: f32[1,128], index: 2, kind: input, shape index: {}]   ;;  %s3755_s3 = inlined_call_operand.vmem [shape: bf16[3,128,128], index: 3, kind: input, shape index: {}]   ;;  %s3756_s4 = inlined_call_operand.vmem [shape: f32[512,128], index: 4, kind: output, shape index: {0}]   ;;  %s3757_s5 = inlined_call_operand.vmem [shape: f32[16,128], index: 5, kind: output, shape index: {1}]  }
   0x1 LB: > { %s2916_s19 = sadd.s32 4294967295, %s2876_s18   ;;  %p2165_p0 = scmp.ge.s32.totalorder %s2876_s18, 1  ;;  %s2876_s18 = sphi %s2910_s18, %s16_s18  }
   0x2   : > { %p191_p1 = scmp.lt.s32.totalorder %s2876_s18, 3 }
   0x4   : > { %p192_p2 = pnand %p2165_p0, %p191_p1 }
   0x5   : > { %v2846_v0 = vld [vmem:[%s3755_s3 + $0x40] sm:$0xff] (!%p192_p2)   ;;  %s2166_s22 = sshll.u32 (!%p192_p2), %s2916_s19, 5  ;;  %v414_v1 = vlaneseq (!%p192_p2)  ;;  %v2848_v3 = vld [vmem:[%s3755_s3 + $0x48] sm:$0xff] (!%p192_p2)   ;;  %v2850_v5 = vld [vmem:[%s3755_s3 + $0x50] sm:$0xff] (!%p192_p2)   ;;  %v2878_v25 = vmov (!%p192_p2), 0   ;;  %p235_p4 = scmp.lt.s32.totalorder (!%p192_p2), %s2916_s19, 1 }
   0x6   : > { %195 = sbr.rel (%p192_p2) target bundleno = 368 (0x170), region = 36  ;;  %v2927_v2 = vld [vmem:[%s3755_s3] sm:$0xff] (!%p192_p2)   ;;  %2612 = vmatprep.subr.bf16.mxu1 (!%p192_p2), %v2846_v0  ;;  %p224_p3 = scmp.lt.s32.totalorder (!%p192_p2), %s2166_s22, 63  ;;  %v2936_v4 = vld [vmem:[%s3755_s3 + $0x8] sm:$0xff] (!%p192_p2)   ;;  %v2948_v7 = vld [vmem:[%s3755_s3 + $0x10] sm:$0xff] (!%p192_p2)   ;;  %2676 = vmatprep.mubr.bf16.mxu0 (!%p192_p2), %v2878_v25 }
   0x7   : > { %2660 = vmatprep.subr.bf16.mxu0 (!%p192_p2), %v2927_v2  ;;  %2613 = vmatpush3.bf16.msra.mxu1 (!%p192_p2), %v2846_v0  ;;  %v2942_v6 = vshrl.u32 (!%p192_p2), %v414_v1, 7  ;;  %v2852_v8 = vld [vmem:[%s3755_s3 + $0x58] sm:$0xff] (!%p192_p2)   ;;  %v2963_v11 = vand.u32 (!%p192_p2), 127, %v414_v1  ;;  %v2854_v13 = vld [vmem:[%s3755_s3 + $0x60] sm:$0xff] (!%p192_p2)   ;;  %v2856_v16 = vld [vmem:[%s3755_s3 + $0x68] sm:$0xff] (!%p192_p2)  }
   0x8   : > { %2661 = vmatpush3.bf16.msra.mxu0 (!%p192_p2), %v2927_v2  ;;  %2614 = vmatprep.subr.bf16.mxu1 (!%p192_p2), %v2848_v3  ;;  %v2961_v10 = vld [vmem:[%s3755_s3 + $0x18] sm:$0xff] (!%p192_p2)   ;;  %v2975_v15 = vld [vmem:[%s3755_s3 + $0x20] sm:$0xff] (!%p192_p2)   ;;  %v2992_v17 = vld [vmem:[%s3755_s3 + $0x28] sm:$0xff] (!%p192_p2)  }
   0x9   : > { %2662 = vmatprep.subr.bf16.mxu0 (!%p192_p2), %v2936_v4  ;;  %v416_v9 = vadd.s32 (!%p192_p2), 8, %v2942_v6  ;;  %v453_v12 = vand.u32 (!%p192_p2), 15, %v2942_v6  ;;  %vm833_vm0 = vcmp.lt.s32.totalorder (!%p192_p2), %v2963_v11, 8  ;;  %vm962_vm2 = vcmp.ge.s32.totalorder (!%p192_p2), %v2963_v11, 16  ;;  %v2998_v19 = vld [vmem:[%s3753_s1] ss:$0 sm:$0xff] (!%p192_p2) }
   0xa   : > { %vm963_vm3 = vcmp.lt.s32.totalorder (!%p192_p2), %v2963_v11, 24  ;;  %v417_v21 = vadd.s32 (!%p192_p2), 16, %v2942_v6  ;;  %v418_v27 = vadd.s32 (!%p192_p2), 24, %v2942_v6  ;;  %v419_v28 = vadd.s32 (!%p192_p2), 32, %v2942_v6  ;;  %v2858_v29 = vld [vmem:[%s3755_s3 + $0x70] sm:$0xff] (!%p192_p2)   ;;  %v2860_v55 = vld [vmem:[%s3755_s3 + $0x78] sm:$0xff] (!%p192_p2)  }
   0xb   : > { %2615 = vmatpush3.bf16.msra.mxu1 (!%p192_p2), %v2848_v3  ;;  %v460_v14 = vand.u32 (!%p192_p2), 15, %v416_v9  ;;  %vm834_vm1 = vcmp.eq.s32.totalorder (!%p192_p2), %v453_v12, 0  ;;  %v3022_v30 = vld [vmem:[%s3754_s2] ss:$0 sm:$0xff] (!%p192_p2)  ;;  %vm3028_vm6 = vmand (!%p192_p2), %vm962_vm2, %vm963_vm3  ;;  %v420_v35 = vadd.s32 (!%p192_p2), 40, %v2942_v6  ;;  %v3043_v40 = vld [vmem:[%s3755_s3 + $0x30] sm:$0xff] (!%p192_p2)  }
   0xc   : > { %2663 = vmatpush3.bf16.msra.mxu0 (!%p192_p2), %v2936_v4  ;;  %2616 = vmatprep.subr.bf16.mxu1 (!%p192_p2), %v2850_v5  ;;  %vm3008_vm5 = vmand (!%p192_p2), %vm833_vm0, %vm834_vm1  ;;  %v467_v34 = vand.u32 (!%p192_p2), 15, %v417_v21  ;;  %v474_v38 = vand.u32 (!%p192_p2), 15, %v418_v27  ;;  %v481_v39 = vand.u32 (!%p192_p2), 15, %v419_v28  ;;  %v3099_v3 = vld [vmem:[%s3755_s3 + $0x38] sm:$0xff] (!%p192_p2)   ;;  %v421_v12 = vadd.s32 (!%p192_p2), 48, %v2942_v6 }
   0xd   : > { %s3874_s22 = smov (!%p224_p3, %s2166_s22), 63  ;;  %2664 = vmatprep.subr.bf16.mxu0 %v2948_v7  ;;  %vm3000_vm4 = vcmp.eq.s32.totalorder %v460_v14, 15  ;;  %v488_v45 = vand.u32 15, %v420_v35  ;;  %vm2311_vm10 = vmneg %vm3008_vm5  ;;  %v426_v63 = vadd.s32 88, %v2942_v6  ;;  %v435_v60 = vadd.s32 160, %v2942_v6  ;;  %s3876_s19 = smov (!%p235_p4, %s2916_s19), 1 }
   0xe   : > { %s2167_s12 = sshll.u32 %s3874_s22, 2  ;;  %vm1062_vm7 = vmand %vm3028_vm6, %vm3000_vm4  ;;  %vm3047_vm9 = vcmp.eq.s32.totalorder %v467_v34, 0  ;;  %vm3057_vm11 = vcmp.eq.s32.totalorder %v474_v38, 15  ;;  %vm3080_vm14 = vcmp.eq.s32.totalorder %v481_v39, 0  ;;  %v2879_v11 = vmov 0.0  }
   0xf   : > { %2617 = vmatpush3.bf16.msra.mxu1 %v2850_v5  ;;  %s2980_s21 = scalar_lea.vmem %s3752_s0, %s2167_s12  ;;  %vm2310_vm8 = vmneg %vm1062_vm7  ;;  %vm3090_vm1 = vcmp.eq.s32.totalorder %v488_v45, 15  ;;  %v424_v45 = vadd.s32 72, %v2942_v6 }
  0x10   : > { %2665 = vmatpush3.bf16.msra.mxu0 %v2948_v7  ;;  %2618 = vmatprep.subr.bf16.mxu1 %v2852_v8  ;;  %v2232_v18 = vld [vmem:[%s2980_s21] sm:$0xff]   ;;  %v2295_v26 = vld [vmem:[%s2980_s21 + $0x8] sm:$0xff]   ;;  %v2296_v44 = vld [vmem:[%s2980_s21 + $0x10] sm:$0xff]  }
  0x11   : > { %2666 = vmatprep.subr.bf16.mxu0 %v2961_v10  ;;  %v2233_v22 = vunpack.c.l.bf16 %v2232_v18  ;;  %v2234_v23 = vunpack.c.h.bf16 %v2232_v18  ;;  %v2237_v32 = vunpack.c.l.bf16 %v2295_v26  ;;  %v2238_v33 = vunpack.c.h.bf16 %v2295_v26  ;;  %v2297_v50 = vld [vmem:[%s2980_s21 + $0x18] sm:$0xff]   ;;  %vm3062_vm12 = vmpackc.low %vm2310_vm8, %vm2311_vm10  ;;  %v2298_v1 = vld [vmem:[%s2980_s21 + $0x20] sm:$0xff]  }
  0x12   : > { %v2241_v49 = vunpack.c.l.bf16 %v2296_v44  ;;  %v2242_v54 = vunpack.c.h.bf16 %v2296_v44  ;;  %vm3075_vm13 = vmand %vm833_vm0, %vm3047_vm9  ;;  %v2245_v0 = vunpack.c.l.bf16 %v2297_v50  ;;  %v2246_v9 = vunpack.c.h.bf16 %v2297_v50  ;;  %v2862_v26 = vld [vmem:[%s3755_s3 + $0x80] sm:$0xff]  }
  0x13   : > { %2619 = vmatpush3.bf16.msra.mxu1 %v2852_v8  ;;  %v311_v36 = vmul.f32 %v2233_v22, %v2998_v19  ;;  %v312_v37 = vmul.f32 %v2234_v23, %v2998_v19  ;;  %v313_v41 = vmul.f32 %v2237_v32, %v2998_v19  ;;  %v314_v42 = vmul.f32 %v2238_v33, %v2998_v19  ;;  %vm1064_vm15 = vmand %vm3028_vm6, %vm3057_vm11 }
  0x14   : > { %2667 = vmatpush3.bf16.msra.mxu0 %v2961_v10  ;;  %2620 = vmatprep.subr.bf16.mxu1 %v2854_v13  ;;  %v315_v59 = vmul.f32 %v2241_v49, %v2998_v19  ;;  %v316_v62 = vmul.f32 %v2242_v54, %v2998_v19  ;;  %vm2315_vm2 = vmneg %vm1064_vm15  ;;  %v422_v18 = vadd.s32 56, %v2942_v6  ;;  %v318_v22 = vmul.f32 %v2246_v9, %v2998_v19  ;;  %v2863_v54 = vld [vmem:[%s3755_s3 + $0x88] sm:$0xff]  }
  0x15   : > { %2668 = vmatprep.subr.bf16.mxu0 %v2975_v15  ;;  %v350_v46 = vadd.f32 %v3022_v30, %v311_v36  ;;  %v351_v47 = vadd.f32 %v3022_v30, %v312_v37  ;;  %v352_v52 = vadd.f32 %v3022_v30, %v313_v41  ;;  %v353_v53 = vadd.f32 %v3022_v30, %v314_v42  ;;  %vm2316_vm3 = vmneg %vm3075_vm13  ;;  %v2299_v37 = vld [vmem:[%s2980_s21 + $0x28] sm:$0xff]   ;;  %v2865_v41 = vld [vmem:[%s3755_s3 + $0x98] sm:$0xff]  }
  0x16   : > { %v354_v8 = vadd.f32 %v3022_v30, %v315_v59  ;;  %v355_v14 = vadd.f32 %v3022_v30, %v316_v62  ;;  %vm3113_vm4 = vmpackc.low %vm2315_vm2, %vm2316_vm3  ;;  %v495_v23 = vand.u32 15, %v421_v12  ;;  %v2249_v24 = vunpack.c.l.bf16 %v2298_v1 }
  0x17   : > { %2621 = vmatpush3.bf16.msra.mxu1 %v2854_v13  ;;  %v382_v56 = vmax.f32 %v350_v46, 0.0  ;;  %v383_v57 = vmax.f32 %v351_v47, 0.0  ;;  %v384_v61 = vmax.f32 %v352_v52, 0.0  ;;  %v385_v13 = vmax.f32 %v353_v53, 0.0  ;;  %vm3126_vm5 = vmand %vm833_vm0, %vm3080_vm14  ;;  %v2300_v53 = vld [vmem:[%s2980_s21 + $0x30] sm:$0xff]  }
  0x18   : > { %2669 = vmatpush3.bf16.msra.mxu0 %v2975_v15  ;;  %2622 = vmatprep.subr.bf16.mxu1 %v2856_v16  ;;  %v386_v21 = vmax.f32 %v354_v8, 0.0  ;;  %v387_v27 = vmax.f32 %v355_v14, 0.0  ;;  %v2250_v32 = vunpack.c.h.bf16 %v2298_v1  ;;  %vm1066_vm7 = vmand %vm3028_vm6, %vm3090_vm1  ;;  %v357_v34 = vadd.f32 %v3022_v30, %v318_v22  ;;  %v2864_v14 = vld [vmem:[%s3755_s3 + $0x90] sm:$0xff]  }
  0x19   : > { %2670 = vmatprep.subr.bf16.mxu0 %v2992_v17  ;;  %v3101_v5 = vpack.c.bf16 %v383_v57, %v382_v56  ;;  %v319_v35 = vmul.f32 %v2249_v24, %v2998_v19  ;;  %v423_v36 = vadd.s32 64, %v2942_v6  ;;  %v3140_v38 = vpack.c.bf16 %v385_v13, %v384_v61  ;;  %vm2320_vm8 = vmneg %vm1066_vm7 }
  0x1a   : > { %v3142_v39 = vpack.c.bf16 %v387_v27, %v386_v21  ;;  %vm3144_vm9 = vcmp.eq.s32.totalorder %v495_v23, 0  ;;  %v320_v42 = vmul.f32 %v2250_v32, %v2998_v19  ;;  %vm2321_vm10 = vmneg %vm3126_vm5  ;;  %v2253_v49 = vunpack.c.l.bf16 %v2299_v37 }
  0x1b   : > { %2623 = vmatpush3.bf16.msra.mxu1 %v2856_v16  ;;  %v317_v16 = vmul.f32 %v2245_v0, %v2998_v19  ;;  %2628 = vmatprep.mubr.msk.bf16.mxu1 %vm3062_vm12, %v3101_v5  ;;  %v358_v44 = vadd.f32 %v3022_v30, %v319_v35  ;;  %v509_v46 = vand.u32 15, %v423_v36  ;;  %vm3159_vm13 = vmpackc.low %vm2320_vm8, %vm2321_vm10  ;;  %v2254_v50 = vunpack.c.h.bf16 %v2299_v37  ;;  %v2302_v37 = vld [vmem:[%s2980_s21 + $0x40] sm:$0xff]  }
  0x1c   : > { %2671 = vmatpush3.bf16.msra.mxu0 %v2992_v17  ;;  %2624 = vmatprep.subr.bf16.mxu1 %v2858_v29  ;;  %v359_v48 = vadd.f32 %v3022_v30, %v320_v42  ;;  %v425_v52 = vadd.s32 80, %v2942_v6  ;;  %v389_v56 = vmax.f32 %v357_v34, 0.0  ;;  %vm3173_vm14 = vmand %vm833_vm0, %vm3144_vm9  ;;  %v516_v59 = vand.u32 15, %v424_v45  ;;  %v2305_v42 = vld [vmem:[%s2980_s21 + $0x58] sm:$0xff]  }
  0x1d   : > { %2672 = vmatprep.subr.bf16.mxu0 %v3043_v40  ;;  %v356_v33 = vadd.f32 %v3022_v30, %v317_v16  ;;  %v390_v58 = vmax.f32 %v358_v44, 0.0  ;;  %vm3184_vm1 = vcmp.eq.s32.totalorder %v509_v46, 0  ;;  %v321_v61 = vmul.f32 %v2253_v49, %v2998_v19  ;;  %vm2326_vm3 = vmneg %vm3173_vm14 }
  0x1e   : > { %v322_v62 = vmul.f32 %v2254_v50, %v2998_v19  ;;  %v391_v0 = vmax.f32 %v359_v48, 0.0  ;;  %v523_v1 = vand.u32 15, %v425_v52  ;;  %v2257_v8 = vunpack.c.l.bf16 %v2300_v53  ;;  %vm3227_vm7 = vmand %vm833_vm0, %vm3184_vm1 }
  0x1f   : > { %2625 = vmatpush3.bf16.msra.mxu1 %v2858_v29  ;;  %v502_v29 = vand.u32 15, %v422_v18  ;;  %v2258_v9 = vunpack.c.h.bf16 %v2300_v53  ;;  %vm3200_vm5 = vcmp.eq.s32.totalorder %v516_v59, 15  ;;  %v360_v51 = vadd.f32 %v3022_v30, %v321_v61  ;;  %v2866_v59 = vld [vmem:[%s3755_s3 + $0xa0] sm:$0xff]  }
  0x20   : > { %2673 = vmatpush3.bf16.msra.mxu0 %v3043_v40  ;;  %2626 = vmatprep.subr.bf16.mxu1 %v2860_v55  ;;  %v530_v16 = vand.u32 15, %v426_v63  ;;  %v323_v18 = vmul.f32 %v2257_v8, %v2998_v19  ;;  %v427_v22 = vadd.s32 96, %v2942_v6  ;;  %vm1070_vm8 = vmand %vm3028_vm6, %vm3200_vm5  ;;  %v3237_v27 = vpack.c.bf16 %v391_v0, %v390_v58  ;;  %v2303_v58 = vld [vmem:[%s2980_s21 + $0x48] sm:$0xff]  }
  0x21   : > { %2674 = vmatprep.subr.bf16.mxu0 %v3099_v3  ;;  %vm3151_vm11 = vcmp.eq.s32.totalorder %v502_v29, 15  ;;  %v324_v21 = vmul.f32 %v2258_v9, %v2998_v19  ;;  %v392_v28 = vmax.f32 %v360_v51, 0.0  ;;  %vm3239_vm9 = vcmp.eq.s32.totalorder %v523_v1, 0  ;;  %vm3243_vm10 = vmneg %vm1070_vm8 }
  0x22   : > { %vm1068_vm15 = vmand %vm3028_vm6, %vm3151_vm11  ;;  %vm3256_vm14 = vcmp.eq.s32.totalorder %v530_v16, 15  ;;  %v537_v43 = vand.u32 15, %v427_v22  ;;  %v429_v45 = vadd.s32 112, %v2942_v6  ;;  %v430_v50 = vadd.s32 120, %v2942_v6 }
  0x23   : > { %2627 = vmatpush3.bf16.msra.mxu1 %v2860_v55  ;;  %v388_v55 = vmax.f32 %v356_v33, 0.0  ;;  %vm2325_vm2 = vmneg %vm1068_vm15  ;;  %v363_v35 = vadd.f32 %v3022_v30, %v324_v21  ;;  %v2265_v53 = vunpack.c.l.bf16 %v2302_v37  ;;  %v431_v8 = vadd.s32 128, %v2942_v6 }
  0x24   : > { %2675 = vmatpush3.bf16.msra.mxu0 %v3099_v3  ;;  %2756 = vmatprep.subr.bf16.mxu1 %v2927_v2  ;;  %vm2331_vm11 = vmneg %vm3227_vm7  ;;  %vm3301_vm5 = vcmp.eq.s32.totalorder %v537_v43, 0  ;;  %v551_v63 = vand.u32 15, %v429_v45  ;;  %v558_v1 = vand.u32 15, %v430_v50  ;;  %v2269_v51 = vunpack.c.l.bf16 %v2303_v58  ;;  %v2868_v45 = vld [vmem:[%s3755_s3 + $0xb0] sm:$0xff]  }
  0x25   : > { %2708 = vmatprep.subr.bf16.mxu0 %v2862_v26  ;;  %v3220_v23 = vpack.c.bf16 %v389_v56, %v388_v55  ;;  %vm3267_vm15 = vmpackc.low %vm3243_vm10, %vm2331_vm11  ;;  %v395_v57 = vmax.f32 %v363_v35, 0.0  ;;  %v2270_v16 = vunpack.c.h.bf16 %v2303_v58  ;;  %v2277_v58 = vunpack.c.l.bf16 %v2305_v42 }
  0x26   : > { %2629 = vmatmul.mubr.msk.bf16.vlgmr.msra.gmra.mrb[0].mxu1 %vm3113_vm4, %v3140_v38  ;;  %vm3283_vm1 = vmand %vm833_vm0, %vm3239_vm9 }
  0x27   : > { %2677 = vmatmul.mubr.msk.bf16.vlgmr.msra.gmra.mrb[0].mxu0 %vm3062_vm12, %v3101_v5  ;;  %2764 = vmatpush3.bf16.msra.mxu1 %v2927_v2  ;;  %v361_v2 = vadd.f32 %v3022_v30, %v322_v62  ;;  %v2301_v5 = vld [vmem:[%s2980_s21 + $0x38] sm:$0xff]   ;;  %vm3210_vm12 = vmpackc.low %vm2325_vm2, %vm2326_vm3 }
  0x28   : > { %2709 = vmatpush3.bf16.msra.mxu0 %v2862_v26  ;;  %2632 = vmatprep.mubr.msk.bf16.mxu1 %vm3159_vm13, %v3142_v39  ;;  %v428_v26 = vadd.s32 104, %v2942_v6  ;;  %v2261_v32 = vunpack.c.l.bf16 %v2301_v5  ;;  %v2262_v36 = vunpack.c.h.bf16 %v2301_v5  ;;  %vm1072_vm2 = vmand %vm3028_vm6, %vm3256_vm14  ;;  %vm3340_vm14 = vcmp.eq.s32.totalorder %v551_v63, 0  ;;  %v2869_v63 = vld [vmem:[%s3755_s3 + $0xb8] sm:$0xff]  }
  0x29   : > { %2710 = vmatprep.subr.bf16.mxu0 %v2863_v54  ;;  %2680 = vmatprep.mubr.msk.bf16.mxu0 %vm3113_vm4, %v3140_v38  ;;  %v393_v34 = vmax.f32 %v361_v2, 0.0  ;;  %vm2335_vm3 = vmneg %vm1072_vm2  ;;  %v2304_v2 = vld [vmem:[%s2980_s21 + $0x50] sm:$0xff]   ;;  %vm3348_vm2 = vcmp.eq.s32.totalorder %v558_v1, 15  ;;  %v436_v1 = vadd.s32 168, %v2942_v6 }
  0x2a   : > { %2757 = vmatprep.subr.bf16.mxu1 %v2936_v4  ;;  %v325_v44 = vmul.f32 %v2261_v32, %v2998_v19  ;;  %v544_v48 = vand.u32 15, %v428_v26  ;;  %v326_v49 = vmul.f32 %v2262_v36, %v2998_v19  ;;  %vm2336_vm7 = vmneg %vm3283_vm1  ;;  %v565_v32 = vand.u32 15, %v431_v8 }
  0x2b   : > { %2765 = vmatpush3.bf16.msra.mxu1 %v2936_v4  ;;  %v362_v4 = vadd.f32 %v3022_v30, %v323_v18  ;;  %v3294_v55 = vpack.c.bf16 %v393_v34, %v392_v28  ;;  %vm3316_vm9 = vmpackc.low %vm2335_vm3, %vm2336_vm7  ;;  %v2867_v18 = vld [vmem:[%s3755_s3 + $0xa8] sm:$0xff]   ;;  %v2273_v33 = vunpack.c.l.bf16 %v2304_v2  ;;  %v329_v34 = vmul.f32 %v2269_v51, %v2998_v19 }
  0x2c   : > { %2711 = vmatpush3.bf16.msra.mxu0 %v2863_v54  ;;  %2758 = vmatprep.subr.bf16.mxu1 %v2948_v7  ;;  %v2266_v54 = vunpack.c.h.bf16 %v2302_v37  ;;  %v364_v61 = vadd.f32 %v3022_v30, %v325_v44  ;;  %v365_v62 = vadd.f32 %v3022_v30, %v326_v49  ;;  %vm3309_vm8 = vcmp.eq.s32.totalorder %v544_v48, 15  ;;  %vm3326_vm10 = vmand %vm833_vm0, %vm3301_vm5 }
  0x2d   : > { %2712 = vmatprep.subr.bf16.mxu0 %v2864_v14  ;;  %v394_v56 = vmax.f32 %v362_v4, 0.0  ;;  %vm1074_vm11 = vmand %vm3028_vm6, %vm3309_vm8  ;;  %v433_v4 = vadd.s32 144, %v2942_v6  ;;  %v2274_v35 = vunpack.c.h.bf16 %v2304_v2  ;;  %v434_v48 = vadd.s32 152, %v2942_v6 }
  0x2e   : > { %2633 = vmatmul.mubr.msk.bf16.gmra.mrb[4].mxu1 %vm3210_vm12, %v3220_v23  ;;  %v328_v12 = vmul.f32 %v2266_v54, %v2998_v19  ;;  %v396_v22 = vmax.f32 %v364_v61, 0.0  ;;  %v397_v24 = vmax.f32 %v365_v62, 0.0  ;;  %vm2340_vm1 = vmneg %vm1074_vm11  ;;  %v331_v52 = vmul.f32 %v2273_v33, %v2998_v19 }
  0x2f   : > { %2681 = vmatmul.mubr.msk.bf16.gmra.mrb[4].mxu0 %vm3159_vm13, %v3142_v39  ;;  %2636 = vmatprep.mubr.msk.bf16.mxu1 %vm3267_vm15, %v3237_v27  ;;  %v3338_v21 = vpack.c.bf16 %v395_v57, %v394_v56  ;;  %vm2341_vm3 = vmneg %vm3326_vm10  ;;  %vm3392_vm10 = vcmp.eq.s32.totalorder %v565_v32, 0  ;;  %v368_v56 = vadd.f32 %v3022_v30, %v329_v34  ;;  %v579_v57 = vand.u32 15, %v433_v4  ;;  %v2308_v34 = vld [vmem:[%s2980_s21 + $0x70] sm:$0xff]  }
  0x30   : > { %2713 = vmatpush3.bf16.msra.mxu0 %v2864_v14  ;;  %2684 = vmatprep.mubr.msk.bf16.mxu0 %vm3210_vm12, %v3220_v23  ;;  %v432_v14 = vadd.s32 136, %v2942_v6  ;;  %vm3362_vm5 = vmpackc.low %vm2340_vm1, %vm2341_vm3  ;;  %v3382_v44 = vpack.c.bf16 %v397_v24, %v396_v22  ;;  %v2278_v61 = vunpack.c.h.bf16 %v2305_v42  ;;  %v586_v0 = vand.u32 15, %v434_v48  ;;  %v2307_v48 = vld [vmem:[%s2980_s21 + $0x68] sm:$0xff]  }
  0x31   : > { %2714 = vmatprep.subr.bf16.mxu0 %v2865_v41  ;;  %2766 = vmatpush3.bf16.msra.mxu1 %v2948_v7  ;;  %v327_v7 = vmul.f32 %v2265_v53, %v2998_v19  ;;  %vm3378_vm7 = vmand %vm833_vm0, %vm3340_vm14  ;;  %v332_v53 = vmul.f32 %v2274_v35, %v2998_v19  ;;  %v370_v8 = vadd.f32 %v3022_v30, %v331_v52  ;;  %v400_v2 = vmax.f32 %v368_v56, 0.0 }
  0x32   : > { %2759 = vmatprep.subr.bf16.mxu1 %v2961_v10  ;;  %v572_v37 = vand.u32 15, %v432_v14  ;;  %vm1076_vm8 = vmand %vm3028_vm6, %vm3348_vm2  ;;  %v333_v14 = vmul.f32 %v2277_v58, %v2998_v19  ;;  %v593_v22 = vand.u32 15, %v435_v60  ;;  %v334_v24 = vmul.f32 %v2278_v61, %v2998_v19 }
  0x33   : > { %v366_v29 = vadd.f32 %v3022_v30, %v327_v7  ;;  %vm2345_vm11 = vmneg %vm1076_vm8  ;;  %vm3439_vm8 = vcmp.eq.s32.totalorder %v579_v57, 0  ;;  %v437_v26 = vadd.s32 176, %v2942_v6  ;;  %v600_v28 = vand.u32 15, %v436_v1  ;;  %v2309_v57 = vld [vmem:[%s2980_s21 + $0x78] sm:$0xff]  }
  0x34   : > { %2715 = vmatpush3.bf16.msra.mxu0 %v2865_v41  ;;  %v330_v41 = vmul.f32 %v2270_v16, %v2998_v19  ;;  %vm2346_vm14 = vmneg %vm3378_vm7  ;;  %vm3403_vm1 = vcmp.eq.s32.totalorder %v572_v37, 15  ;;  %v2306_v16 = vld [vmem:[%s2980_s21 + $0x60] sm:$0xff]   ;;  %v372_v35 = vadd.f32 %v3022_v30, %v333_v14  ;;  %v373_v42 = vadd.f32 %v3022_v30, %v334_v24  ;;  %s2170_s21 = sshll.u32 %s3876_s19, 3  ;;  %s2169_s19 = sshll.u32 %s3874_s22, 3 }
  0x35   : > { %2716 = vmatprep.subr.bf16.mxu0 %v2866_v59  ;;  %2767 = vmatpush3.bf16.msra.mxu1 %v2961_v10  ;;  %v367_v10 = vadd.f32 %v3022_v30, %v328_v12  ;;  %v398_v49 = vmax.f32 %v366_v29, 0.0  ;;  %vm3409_vm2 = vmpackc.low %vm2345_vm11, %vm2346_vm14  ;;  %v371_v12 = vadd.f32 %v3022_v30, %v332_v53  ;;  %vm3453_vm14 = vcmp.eq.s32.totalorder %v586_v0, 15  ;;  %s3691_s11 = scalar_lea.vmem %s3757_s5, %s2170_s21  ;;  %s3708_s14 = scalar_lea.vmem %s3756_s4, %s2169_s19 }
  0x36   : > { %2637 = vmatmul.mubr.msk.bf16.gmra.mrb[8].mxu1 %vm3316_vm9, %v3294_v55  ;;  %2760 = vmatprep.subr.bf16.mxu1 %v2975_v15  ;;  %vm3424_vm3 = vmand %vm833_vm0, %vm3392_vm10  ;;  %v438_v29 = vadd.s32 184, %v2942_v6  ;;  %v2281_v33 = vunpack.c.l.bf16 %v2306_v16  ;;  %v607_v43 = vand.u32 15, %v437_v26  ;;  %v2290_v50 = vunpack.c.h.bf16 %v2308_v34  ;;  %2073 = vst [vmem:[%s3691_s11 + $0x2] sm:$0x3f] %v2879_v11 }
  0x37   : > { %2685 = vmatmul.mubr.msk.bf16.gmra.mrb[8].mxu0 %vm3267_vm15, %v3237_v27  ;;  %2640 = vmatprep.mubr.msk.bf16.mxu1 %vm3362_vm5, %v3338_v21  ;;  %v399_v54 = vmax.f32 %v367_v10, 0.0  ;;  %vm1078_vm7 = vmand %vm3028_vm6, %vm3403_vm1  ;;  %v403_v32 = vmax.f32 %v371_v12, 0.0  ;;  %v2282_v10 = vunpack.c.h.bf16 %v2306_v16  ;;  %v439_v56 = vadd.s32 192, %v2942_v6 }
  0x38   : > { %2717 = vmatpush3.bf16.msra.mxu0 %v2866_v59  ;;  %2688 = vmatprep.mubr.msk.bf16.mxu0 %vm3316_vm9, %v3294_v55  ;;  %vm2350_vm10 = vmneg %vm1078_vm7  ;;  %vm3483_vm7 = vcmp.eq.s32.totalorder %v593_v22, 0  ;;  %v335_v53 = vmul.f32 %v2281_v33, %v2998_v19  ;;  %v404_v59 = vmax.f32 %v372_v35, 0.0  ;;  %v340_v61 = vmul.f32 %v2290_v50, %v2998_v19 }
  0x39   : > { %2718 = vmatprep.subr.bf16.mxu0 %v2867_v18  ;;  %2768 = vmatpush3.bf16.msra.mxu1 %v2975_v15  ;;  %v369_v15 = vadd.f32 %v3022_v30, %v330_v41  ;;  %v3437_v51 = vpack.c.bf16 %v399_v54, %v398_v49  ;;  %vm2351_vm11 = vmneg %vm3424_vm3  ;;  %v2289_v49 = vunpack.c.l.bf16 %v2308_v34  ;;  %v336_v54 = vmul.f32 %v2282_v10, %v2998_v19 }
  0x3a   : > { %2761 = vmatprep.subr.bf16.mxu1 %v2992_v17  ;;  %vm3471_vm1 = vmand %vm833_vm0, %vm3439_vm8  ;;  %v2286_v0 = vunpack.c.h.bf16 %v2307_v48  ;;  %v379_v13 = vadd.f32 %v3022_v30, %v340_v61  ;;  %v2294_v5 = vunpack.c.h.bf16 %v2309_v57  ;;  %v3856_v24 = vmov 0 }
  0x3b   : > { %vm1080_vm3 = vmand %vm3028_vm6, %vm3453_vm14  ;;  %v339_v60 = vmul.f32 %v2289_v49, %v2998_v19  ;;  %v375_v12 = vadd.f32 %v3022_v30, %v336_v54  ;;  %v443_v49 = vadd.s32 224, %v2942_v6 }
  0x3c   : > { %2719 = vmatpush3.bf16.msra.mxu0 %v2867_v18  ;;  %v401_v18 = vmax.f32 %v369_v15, 0.0  ;;  %vm2355_vm8 = vmneg %vm1080_vm3  ;;  %v440_v15 = vadd.s32 200, %v2942_v6 }
  0x3d   : > { %2720 = vmatprep.subr.bf16.mxu0 %v2868_v45  ;;  %2769 = vmatpush3.bf16.msra.mxu1 %v2992_v17  ;;  %v378_v7 = vadd.f32 %v3022_v30, %v339_v60  ;;  %v338_v17 = vmul.f32 %v2286_v0, %v2998_v19  ;;  %v407_v35 = vmax.f32 %v375_v12, 0.0  ;;  %v649_v54 = vand.u32 15, %v443_v49 }
  0x3e   : > { %2641 = vmatmul.mubr.msk.bf16.gmra.mrb[12].mxu1 %vm3409_vm2, %v3382_v44  ;;  %2762 = vmatprep.subr.bf16.mxu1 %v3043_v40  ;;  %v3481_v37 = vpack.c.bf16 %v401_v18, %v400_v2  ;;  %v621_v2 = vand.u32 15, %v439_v56  ;;  %v628_v14 = vand.u32 15, %v440_v15  ;;  %v411_v18 = vmax.f32 %v379_v13, 0.0 }
  0x3f   : > { %2689 = vmatmul.mubr.msk.bf16.gmra.mrb[12].mxu0 %vm3362_vm5, %v3338_v21  ;;  %v410_v16 = vmax.f32 %v378_v7, 0.0  ;;  %v3864_v56 = vmov 0  ;;  %v446_v15 = vadd.s32 248, %v2942_v6 }
  0x40   : > { %2721 = vmatpush3.bf16.msra.mxu0 %v2868_v45  ;;  %2724 = vmatprep.mubr.msk.bf16.mxu0 %vm3113_vm4, %v3140_v38  ;;  %vm3459_vm4 = vmpackc.low %vm2350_vm10, %vm2351_vm11  ;;  %v402_v38 = vmax.f32 %v370_v8, 0.0  ;;  %vm3489_vm10 = vcmp.eq.s32.totalorder %v600_v28, 15  ;;  %v614_v45 = vand.u32 15, %v438_v29  ;;  %v374_v8 = vadd.f32 %v3022_v30, %v335_v53 }
  0x41   : > { %2722 = vmatprep.subr.bf16.mxu0 %v2869_v63  ;;  %2644 = vmatprep.mubr.msk.bf16.mxu1 %vm3459_vm4, %v3437_v51  ;;  %vm2356_vm11 = vmneg %vm3471_vm1  ;;  %v441_v28 = vadd.s32 208, %v2942_v6  ;;  %v342_v29 = vmul.f32 %v2294_v5, %v2998_v19  ;;  %v3566_v33 = vpack.c.bf16 %v411_v18, %v410_v16 }
  0x42   : > { %2770 = vmatpush3.bf16.msra.mxu1 %v3043_v40  ;;  %v3496_v52 = vpack.c.bf16 %v403_v32, %v402_v38  ;;  %vm3502_vm14 = vmpackc.low %vm2355_vm8, %vm2356_vm11  ;;  %v442_v32 = vadd.s32 216, %v2942_v6  ;;  %v406_v34 = vmax.f32 %v374_v8, 0.0  ;;  %v377_v40 = vadd.f32 %v3022_v30, %v338_v17 }
  0x43   : > { %2763 = vmatprep.subr.bf16.mxu1 %v3099_v3  ;;  %vm3520_vm1 = vmand %vm833_vm0, %vm3483_vm7  ;;  %vm3535_vm7 = vcmp.eq.s32.totalorder %v614_v45, 15  ;;  %v381_v4 = vadd.f32 %v3022_v30, %v342_v29  ;;  %v635_v46 = vand.u32 15, %v441_v28  ;;  %v3862_v45 = vmov 0 }
  0x44   : > { %2723 = vmatpush3.bf16.msra.mxu0 %v2869_v63  ;;  %vm1082_vm3 = vmand %vm3028_vm6, %vm3489_vm10  ;;  %v409_v53 = vmax.f32 %v377_v40, 0.0 }
  0x45   : > { %vm2361_vm8 = vmneg %vm3520_vm1 }
  0x46   : > { %2771 = vmatpush3.bf16.msra.mxu1 %v3099_v3  ;;  %v2285_v3 = vunpack.c.l.bf16 %v2307_v48  ;;  %vm1084_vm1 = vmand %vm3028_vm6, %vm3535_vm7  ;;  %v642_v48 = vand.u32 15, %v442_v32 }
  0x47   : > { %2725 = vmatmul.mubr.msk.bf16.vlgmr.msra.gmra.mrb[0].mxu0 %vm3159_vm13, %v3142_v39  ;;  %2645 = vmatmul.mubr.msk.bf16.gmra.mrb[16].mxu1 %vm3502_vm14, %v3481_v37  ;;  %v405_v39 = vmax.f32 %v373_v42, 0.0  ;;  %vm3527_vm13 = vcmp.eq.s32.totalorder %v607_v43, 0 }
  0x48   : > { %2728 = vmatprep.mubr.msk.bf16.mxu0 %vm3210_vm12, %v3220_v23  ;;  %v2293_v23 = vunpack.c.l.bf16 %v2309_v57  ;;  %vm2360_vm12 = vmneg %vm1082_vm3  ;;  %v337_v26 = vmul.f32 %v2285_v3, %v2998_v19  ;;  %vm858_vm3 = vcmp.eq.s32.totalorder %v621_v2, 0 }
  0x49   : > { %vm3546_vm10 = vmpackc.low %vm2360_vm12, %vm2361_vm8  ;;  %vm3579_vm12 = vcmp.eq.s32.totalorder %v628_v14, 15 }
  0x4a   : > { %v341_v22 = vmul.f32 %v2293_v23, %v2998_v19  ;;  %v3857_v24 = vsel %vm3546_vm10, 4294967295, %v3856_v24  ;;  %2648 = vmatprep.mubr.msk.bf16.mxu1 %vm3546_vm10, %v3496_v52  ;;  %vm3561_vm11 = vmand %vm833_vm0, %vm3527_vm13  ;;  %v3573_v19 = vpack.c.bf16 %v405_v39, %v404_v59  ;;  %v376_v43 = vadd.f32 %v3022_v30, %v337_v26 }
  0x4b   : > { %vm2365_vm13 = vmneg %vm1084_vm1  ;;  %vm860_vm1 = vcmp.eq.s32.totalorder %v635_v46, 0  ;;  %v445_v59 = vadd.s32 240, %v2942_v6 }
  0x4c   : > { %v380_v10 = vadd.f32 %v3022_v30, %v341_v22  ;;  %vm2366_vm7 = vmneg %vm3561_vm11  ;;  %v2373_v30 = vpack.c.bf16 %v407_v35, %v406_v34  ;;  %v408_v50 = vmax.f32 %v376_v43, 0.0 }
  0x4d   : > { %vm1086_vm8 = vmand %vm3028_vm6, %vm3579_vm12  ;;  %v663_v61 = vand.u32 15, %v445_v59 }
  0x4e   : > { %v412_v42 = vmax.f32 %v380_v10, 0.0  ;;  %vm2370_vm11 = vmneg %vm1086_vm8  ;;  %v2378_v60 = vpack.c.bf16 %v409_v53, %v408_v50  ;;  %vm862_vm8 = vcmp.eq.s32.totalorder %v649_v54, 0 }
  0x4f   : > { %2729 = vmatmul.mubr.msk.bf16.gmra.mrb[4].mxu0 %vm3267_vm15, %v3237_v27  ;;  %v413_v27 = vmax.f32 %v381_v4, 0.0  ;;  %vm3590_vm15 = vmpackc.low %vm2365_vm13, %vm2366_vm7  ;;  %vm992_vm7 = vcmp.eq.s32.totalorder %v642_v48, 15 }
  0x50   : > { %2732 = vmatprep.mubr.msk.bf16.mxu0 %vm3316_vm9, %v3294_v55  ;;  %v3863_v45 = vsel %vm3590_vm15, 4294967295, %v3862_v45  ;;  %2649 = vmatmul.mubr.msk.bf16.gmra.mrb[20].mxu1 %vm3590_vm15, %v3573_v19  ;;  %vm954_vm9 = vmand %vm833_vm0, %vm858_vm3  ;;  %v444_v55 = vadd.s32 232, %v2942_v6 }
  0x51   : > { %v2388_v9 = vpack.c.bf16 %v413_v27, %v412_v42  ;;  %vm2371_vm13 = vmneg %vm954_vm9 }
  0x52   : > { %vm3605_vm15 = vmpackc.low %vm2370_vm11, %vm2371_vm13  ;;  %v656_v57 = vand.u32 15, %v444_v55 }
  0x53   : > { %v3865_v56 = vsel %vm3605_vm15, 4294967295, %v3864_v56  ;;  %2652 = vmatprep.mubr.msk.bf16.mxu1 %vm3605_vm15, %v2373_v30  ;;  %vm956_vm3 = vmand %vm833_vm0, %vm860_vm1 }
  0x54   : > { %vm1088_vm12 = vmand %vm3028_vm6, %vm992_vm7  ;;  %vm994_vm13 = vcmp.eq.s32.totalorder %v656_v57, 15 }
  0x55   : > { %vm2375_vm9 = vmneg %vm1088_vm12  ;;  %vm864_vm12 = vcmp.eq.s32.totalorder %v663_v61, 0 }
  0x56   : > { %vm2376_vm11 = vmneg %vm956_vm3 }
  0x57   : > { %2733 = vmatmul.mubr.msk.bf16.gmra.mrb[8].mxu0 %vm3362_vm5, %v3338_v21  ;;  %vm3623_vm1 = vmpackc.low %vm2375_vm9, %vm2376_vm11  ;;  %v670_v21 = vand.u32 15, %v446_v15 }
  0x58   : > { %2736 = vmatprep.mubr.msk.bf16.mxu0 %vm3409_vm2, %v3382_v44  ;;  %2653 = vmatmul.mubr.msk.bf16.gmra.mrb[24].mxu1 %vm3623_vm1, %v2378_v60  ;;  %vm958_vm5 = vmand %vm833_vm0, %vm862_vm8 }
  0x59   : > { %vm1090_vm7 = vmand %vm3028_vm6, %vm994_vm13  ;;  %vm996_vm3 = vcmp.eq.s32.totalorder %v670_v21, 15 }
  0x5a   : > { %vm2380_vm15 = vmneg %vm1090_vm7 }
  0x5b   : > { %vm2381_vm10 = vmneg %vm958_vm5 }
  0x5c   : > { %vm3636_vm9 = vmpackc.low %vm2380_vm15, %vm2381_vm10  ;;  %vm3870_vm15 = vnez %v3857_v24 }
  0x5d   : > { %2656 = vmatprep.mubr.msk.bf16.mxu1 %vm3636_vm9, %v3566_v33  ;;  %vm960_vm8 = vmand %vm833_vm0, %vm864_vm12  ;;  %vm3871_vm0 = vnez %v3863_v45 }
  0x5e   : > { %vm1092_vm11 = vmand %vm3028_vm6, %vm996_vm3  ;;  %vm3872_vm6 = vnez %v3865_v56 }
  0x5f   : > { %2737 = vmatmul.mubr.msk.bf16.gmra.mrb[12].mxu0 %vm3459_vm4, %v3437_v51  ;;  %vm2385_vm13 = vmneg %vm1092_vm11 }
  0x60   : > { %2740 = vmatprep.mubr.msk.bf16.mxu0 %vm3502_vm14, %v3481_v37  ;;  %vm2386_vm5 = vmneg %vm960_vm8 }
  0x61   : > { %vm2387_vm10 = vmpackc.low %vm2385_vm13, %vm2386_vm5 }
  0x62   : > { %2657 = vmatmul.mubr.msk.bf16.gmra.mrb[28].mxu1 %vm2387_vm10, %v2388_v9 }
  0x63   : > { %2692 = vmatprep.mubr.msk.bf16.mxu1 %vm3409_vm2, %v3382_v44 }
  0x67   : > { %2741 = vmatmul.mubr.msk.bf16.gmra.mrb[16].mxu0 %vm3870_vm15, %v3496_v52 }
  0x68   : > { %2744 = vmatprep.mubr.msk.bf16.mxu0 %vm3871_vm0, %v3573_v19 }
  0x6a   : > { %2693 = vmatmul.mubr.msk.bf16.vlgmr.msra.gmra.mrb[16].mxu1 %vm3459_vm4, %v3437_v51 }
  0x6b   : > { %2696 = vmatprep.mubr.msk.bf16.mxu1 %vm3502_vm14, %v3481_v37 }
  0x6f   : > { %2745 = vmatmul.mubr.msk.bf16.gmra.mrb[20].mxu0 %vm3872_vm6, %v2373_v30 }
  0x70   : > { %2748 = vmatprep.mubr.msk.bf16.mxu0 %vm3623_vm1, %v2378_v60 }
  0x72   : > { %2697 = vmatmul.mubr.msk.bf16.gmra.mrb[20].mxu1 %vm3870_vm15, %v3496_v52 }
  0x73   : > { %2700 = vmatprep.mubr.msk.bf16.mxu1 %vm3871_vm0, %v3573_v19 }
  0x77   : > { %2749 = vmatmul.mubr.msk.bf16.gmra.mrb[24].mxu0 %vm3636_vm9, %v3566_v33 }
  0x78   : > { %2752 = vmatprep.mubr.msk.bf16.mxu0 %vm2387_vm10, %v2388_v9 }
  0x7a   : > { %2701 = vmatmul.mubr.msk.bf16.gmra.mrb[24].mxu1 %vm3872_vm6, %v2373_v30 }
  0x7b   : > { %2704 = vmatprep.mubr.msk.bf16.mxu1 %vm3623_vm1, %v2378_v60 }
  0x7f   : > { %2753 = vmatmul.mubr.bf16.gmra.mrb[28].mxu0 %v2878_v25 }
  0x82   : > { %2705 = vmatmul.mubr.msk.bf16.gmra.mrb[28].mxu1 %vm3636_vm9, %v3566_v33 }
  0xf9   : > { %v2630_v31 = vpop.f32.mrb[0].mxu1 }
  0xfa   : > { %v1323_v36 = vpop.f32.mrb[1].mxu1 }
  0xfb   : > { %v2631_v44 = vpop.f32.mrb[2].mxu1 }
  0xfc   : > { %v1326_v25 = vpop.f32.mrb[3].mxu1 }
 0x101   : > { %v2634_v62 = vpop.f32.mrb[4].mxu1 }
 0x102   : > { %v1339_v51 = vpop.f32.mrb[5].mxu1 }
 0x103   : > { %v2635_v20 = vpop.f32.mrb[6].mxu1 }
 0x104   : > { %v1342_v37 = vpop.f32.mrb[7].mxu1 }
 0x109   : > { %v2638_v52 = vpop.f32.mrb[8].mxu1 }
 0x10a   : > { %v1355_v58 = vpop.f32.mrb[9].mxu1 }
 0x10b   : > { %v2639_v39 = vpop.f32.mrb[10].mxu1 }
 0x10c   : > { %v3694_v63 = vpop.f32.mrb[11].mxu1 }
 0x111   : > { %v3696_v3 = vpop.f32.mrb[12].mxu1 }
 0x112   : > { %v3698_v0 = vpop.f32.mrb[13].mxu1 }
 0x113   : > { %v3700_v1 = vpop.f32.mrb[14].mxu1 }
 0x114   : > { %v3702_v7 = vpop.f32.mrb[15].mxu1 }
 0x11a   : > { %v2726_v13 = vpop.f32.mrb[0].mxu0 }
 0x11b   : > { %v2772_v23 = vadd.f32 %v2726_v13, %v2630_v31  ;;  %v1774_v8 = vpop.f32.mrb[1].mxu0 }
 0x11c   : > { %v2773_v12 = vadd.f32 %v1774_v8, %v1323_v36  ;;  %v2727_v2 = vpop.f32.mrb[2].mxu0 }
 0x11d   : > { %1935 = vst [vmem:[%s3708_s14 + $0x10] sm:$0xff] %v2772_v23  ;;  %v2774_v5 = vadd.f32 %v2727_v2, %v2631_v44  ;;  %v1777_v14 = vpop.f32.mrb[3].mxu0  ;;  %v2005_v26 = vmul.f32 %v2772_v23, %v2772_v23 }
 0x11e   : > { %1933 = vst [vmem:[%s3708_s14] sm:$0xff] %v2773_v12  ;;  %v2775_v16 = vadd.f32 %v1777_v14, %v1326_v25  ;;  %v2003_v18 = vmul.f32 %v2773_v12, %v2773_v12 }
 0x11f   : > { %1936 = vst [vmem:[%s3708_s14 + $0x18] sm:$0xff] %v2774_v5  ;;  %v2006_v33 = vmul.f32 %v2774_v5, %v2774_v5 }
 0x120   : > { %1934 = vst [vmem:[%s3708_s14 + $0x8] sm:$0xff] %v2775_v16  ;;  %v1965_v22 = vadd.f32 %v2775_v16, %v2773_v12  ;;  %v2004_v24 = vmul.f32 %v2775_v16, %v2775_v16 }
 0x122   : > { %v1966_v17 = vadd.f32 %v2772_v23, %v1965_v22  ;;  %v2035_v28 = vadd.f32 %v2004_v24, %v2003_v18  ;;  %v2730_v29 = vpop.f32.mrb[4].mxu0 }
 0x123   : > { %v2776_v38 = vadd.f32 %v2730_v29, %v2634_v62  ;;  %v1790_v32 = vpop.f32.mrb[5].mxu0 }
 0x124   : > { %v2036_v10 = vadd.f32 %v2035_v28, %v2005_v26  ;;  %v2777_v19 = vadd.f32 %v1790_v32, %v1339_v51  ;;  %v1967_v34 = vadd.f32 %v2774_v5, %v1966_v17  ;;  %v2731_v4 = vpop.f32.mrb[6].mxu0 }
 0x125   : > { %1939 = vst [vmem:[%s3708_s14 + $0x30] sm:$0xff] %v2776_v38  ;;  %v2778_v35 = vadd.f32 %v2731_v4, %v2635_v20  ;;  %v1793_v41 = vpop.f32.mrb[7].mxu0  ;;  %v2009_v49 = vmul.f32 %v2776_v38, %v2776_v38 }
 0x126   : > { %1937 = vst [vmem:[%s3708_s14 + $0x20] sm:$0xff] %v2777_v19  ;;  %v1968_v42 = vadd.f32 %v2777_v19, %v1967_v34  ;;  %v2007_v43 = vmul.f32 %v2777_v19, %v2777_v19  ;;  %v2037_v40 = vadd.f32 %v2036_v10, %v2006_v33  ;;  %v2779_v46 = vadd.f32 %v1793_v41, %v1342_v37 }
 0x127   : > { %1940 = vst [vmem:[%s3708_s14 + $0x38] sm:$0xff] %v2778_v35  ;;  %v2010_v54 = vmul.f32 %v2778_v35, %v2778_v35 }
 0x128   : > { %v2038_v27 = vadd.f32 %v2037_v40, %v2007_v43  ;;  %1938 = vst [vmem:[%s3708_s14 + $0x28] sm:$0xff] %v2779_v46  ;;  %v1969_v45 = vadd.f32 %v2779_v46, %v1968_v42  ;;  %v2008_v48 = vmul.f32 %v2779_v46, %v2779_v46 }
 0x12a   : > { %v1970_v55 = vadd.f32 %v2776_v38, %v1969_v45  ;;  %v2039_v9 = vadd.f32 %v2038_v27, %v2008_v48  ;;  %v2734_v30 = vpop.f32.mrb[8].mxu0 }
 0x12b   : > { %v2780_v50 = vadd.f32 %v2734_v30, %v2638_v52  ;;  %v1806_v53 = vpop.f32.mrb[9].mxu0 }
 0x12c   : > { %v2040_v56 = vadd.f32 %v2039_v9, %v2009_v49  ;;  %v2781_v57 = vadd.f32 %v1806_v53, %v1355_v58  ;;  %v1971_v59 = vadd.f32 %v2778_v35, %v1970_v55  ;;  %v2735_v15 = vpop.f32.mrb[10].mxu0 }
 0x12d   : > { %1943 = vst [vmem:[%s3708_s14 + $0x50] sm:$0xff] %v2780_v50  ;;  %v2782_v60 = vadd.f32 %v2735_v15, %v2639_v39  ;;  %v1809_v61 = vpop.f32.mrb[11].mxu0  ;;  %v2013_v25 = vmul.f32 %v2780_v50, %v2780_v50 }
 0x12e   : > { %1941 = vst [vmem:[%s3708_s14 + $0x40] sm:$0xff] %v2781_v57  ;;  %v1972_v47 = vadd.f32 %v2781_v57, %v1971_v59  ;;  %v2011_v21 = vmul.f32 %v2781_v57, %v2781_v57  ;;  %v2041_v6 = vadd.f32 %v2040_v56, %v2010_v54  ;;  %v2783_v11 = vadd.f32 %v1809_v61, %v3694_v63 }
 0x12f   : > { %1944 = vst [vmem:[%s3708_s14 + $0x58] sm:$0xff] %v2782_v60  ;;  %v2014_v58 = vmul.f32 %v2782_v60, %v2782_v60 }
 0x130   : > { %v2042_v31 = vadd.f32 %v2041_v6, %v2011_v21  ;;  %1942 = vst [vmem:[%s3708_s14 + $0x48] sm:$0xff] %v2783_v11  ;;  %v1973_v36 = vadd.f32 %v2783_v11, %v1972_v47  ;;  %v2012_v44 = vmul.f32 %v2783_v11, %v2783_v11 }
 0x132   : > { %v1974_v62 = vadd.f32 %v2780_v50, %v1973_v36  ;;  %v2043_v51 = vadd.f32 %v2042_v31, %v2012_v44  ;;  %v2738_v20 = vpop.f32.mrb[12].mxu0 }
 0x133   : > { %v2784_v37 = vadd.f32 %v2738_v20, %v3696_v3  ;;  %v1822_v52 = vpop.f32.mrb[13].mxu0 }
 0x134   : > { %v2044_v39 = vadd.f32 %v2043_v51, %v2013_v25  ;;  %v2785_v63 = vadd.f32 %v1822_v52, %v3698_v0  ;;  %v1975_v13 = vadd.f32 %v2782_v60, %v1974_v62  ;;  %v2739_v23 = vpop.f32.mrb[14].mxu0 }
 0x135   : > { %1947 = vst [vmem:[%s3708_s14 + $0x70] sm:$0xff] %v2784_v37  ;;  %v2786_v8 = vadd.f32 %v2739_v23, %v3700_v1  ;;  %v1825_v12 = vpop.f32.mrb[15].mxu0  ;;  %v2017_v24 = vmul.f32 %v2784_v37, %v2784_v37 }
 0x136   : > { %1945 = vst [vmem:[%s3708_s14 + $0x60] sm:$0xff] %v2785_v63  ;;  %v1976_v2 = vadd.f32 %v2785_v63, %v1975_v13  ;;  %v2015_v5 = vmul.f32 %v2785_v63, %v2785_v63  ;;  %v2045_v14 = vadd.f32 %v2044_v39, %v2014_v58  ;;  %v2787_v16 = vadd.f32 %v1825_v12, %v3702_v7 }
 0x137   : > { %1948 = vst [vmem:[%s3708_s14 + $0x78] sm:$0xff] %v2786_v8  ;;  %v2018_v29 = vmul.f32 %v2786_v8, %v2786_v8 }
 0x138   : > { %v2046_v3 = vadd.f32 %v2045_v14, %v2015_v5  ;;  %1946 = vst [vmem:[%s3708_s14 + $0x68] sm:$0xff] %v2787_v16  ;;  %v1977_v18 = vadd.f32 %v2787_v16, %v1976_v2  ;;  %v2016_v22 = vmul.f32 %v2787_v16, %v2787_v16 }
 0x13a   : > { %v1978_v26 = vadd.f32 %v2784_v37, %v1977_v18  ;;  %v2047_v0 = vadd.f32 %v2046_v3, %v2016_v22  ;;  %v2742_v17 = vpop.f32.mrb[16].mxu0 }
 0x13b   : > { %v1838_v28 = vpop.f32.mrb[17].mxu0 }
 0x13c   : > { %v2048_v1 = vadd.f32 %v2047_v0, %v2017_v24  ;;  %v1979_v38 = vadd.f32 %v2786_v8, %v1978_v26  ;;  %v2743_v32 = vpop.f32.mrb[18].mxu0 }
 0x13d   : > { %v1841_v33 = vpop.f32.mrb[19].mxu0  ;;  %v2694_v19 = vpop.f32.mrb[16].mxu1 }
 0x13e   : > { %v2049_v10 = vadd.f32 %v2048_v1, %v2018_v29  ;;  %v2788_v7 = vadd.f32 %v2742_v17, %v2694_v19  ;;  %v1596_v34 = vpop.f32.mrb[17].mxu1 }
 0x13f   : > { %v2789_v35 = vadd.f32 %v1838_v28, %v1596_v34  ;;  %v2695_v41 = vpop.f32.mrb[18].mxu1 }
 0x140   : > { %1951 = vst [vmem:[%s3708_s14 + $0x90] sm:$0xff] %v2788_v7  ;;  %v2790_v43 = vadd.f32 %v2743_v32, %v2695_v41  ;;  %v1599_v40 = vpop.f32.mrb[19].mxu1  ;;  %v2021_v50 = vmul.f32 %v2788_v7, %v2788_v7 }
 0x141   : > { %1949 = vst [vmem:[%s3708_s14 + $0x80] sm:$0xff] %v2789_v35  ;;  %v1980_v27 = vadd.f32 %v2789_v35, %v1979_v38  ;;  %v2019_v45 = vmul.f32 %v2789_v35, %v2789_v35  ;;  %v2791_v48 = vadd.f32 %v1841_v33, %v1599_v40 }
 0x142   : > { %v2746_v4 = vpop.f32.mrb[20].mxu0  ;;  %1952 = vst [vmem:[%s3708_s14 + $0x98] sm:$0xff] %v2790_v43  ;;  %v2022_v60 = vmul.f32 %v2790_v43, %v2790_v43 }
 0x143   : > { %v1854_v42 = vpop.f32.mrb[21].mxu0  ;;  %v2050_v55 = vadd.f32 %v2049_v10, %v2019_v45  ;;  %1950 = vst [vmem:[%s3708_s14 + $0x88] sm:$0xff] %v2791_v48  ;;  %v1981_v9 = vadd.f32 %v2791_v48, %v1980_v27  ;;  %v2020_v30 = vmul.f32 %v2791_v48, %v2791_v48 }
 0x144   : > { %v2747_v46 = vpop.f32.mrb[22].mxu0 }
 0x145   : > { %v1857_v49 = vpop.f32.mrb[23].mxu0  ;;  %v1982_v53 = vadd.f32 %v2788_v7, %v1981_v9  ;;  %v2051_v54 = vadd.f32 %v2050_v55, %v2020_v30  ;;  %v2698_v56 = vpop.f32.mrb[20].mxu1 }
 0x146   : > { %v2792_v57 = vadd.f32 %v2746_v4, %v2698_v56  ;;  %v1612_v59 = vpop.f32.mrb[21].mxu1 }
 0x147   : > { %v2052_v61 = vadd.f32 %v2051_v54, %v2021_v50  ;;  %v2793_v47 = vadd.f32 %v1854_v42, %v1612_v59  ;;  %v1983_v21 = vadd.f32 %v2790_v43, %v1982_v53  ;;  %v2699_v6 = vpop.f32.mrb[22].mxu1 }
 0x148   : > { %1955 = vst [vmem:[%s3708_s14 + $0xb0] sm:$0xff] %v2792_v57  ;;  %v2794_v31 = vadd.f32 %v2747_v46, %v2699_v6  ;;  %v1615_v36 = vpop.f32.mrb[23].mxu1  ;;  %v2025_v63 = vmul.f32 %v2792_v57, %v2792_v57 }
 0x149   : > { %1953 = vst [vmem:[%s3708_s14 + $0xa0] sm:$0xff] %v2793_v47  ;;  %v1984_v25 = vadd.f32 %v2793_v47, %v1983_v21  ;;  %v2023_v62 = vmul.f32 %v2793_v47, %v2793_v47  ;;  %v2053_v51 = vadd.f32 %v2052_v61, %v2022_v60  ;;  %v2795_v20 = vadd.f32 %v1857_v49, %v1615_v36 }
 0x14a   : > { %v2750_v15 = vpop.f32.mrb[24].mxu0  ;;  %1956 = vst [vmem:[%s3708_s14 + $0xb8] sm:$0xff] %v2794_v31  ;;  %v2026_v14 = vmul.f32 %v2794_v31, %v2794_v31 }
 0x14b   : > { %v1870_v11 = vpop.f32.mrb[25].mxu0  ;;  %v2054_v52 = vadd.f32 %v2053_v51, %v2023_v62  ;;  %1954 = vst [vmem:[%s3708_s14 + $0xa8] sm:$0xff] %v2795_v20  ;;  %v1985_v58 = vadd.f32 %v2795_v20, %v1984_v25  ;;  %v2024_v39 = vmul.f32 %v2795_v20, %v2795_v20 }
 0x14c   : > { %v2751_v44 = vpop.f32.mrb[26].mxu0 }
 0x14d   : > { %v1873_v37 = vpop.f32.mrb[27].mxu0  ;;  %v1986_v13 = vadd.f32 %v2792_v57, %v1985_v58  ;;  %v2055_v23 = vadd.f32 %v2054_v52, %v2024_v39  ;;  %v2702_v8 = vpop.f32.mrb[24].mxu1 }
 0x14e   : > { %v2796_v12 = vadd.f32 %v2750_v15, %v2702_v8  ;;  %v1628_v2 = vpop.f32.mrb[25].mxu1 }
 0x14f   : > { %v2056_v16 = vadd.f32 %v2055_v23, %v2025_v63  ;;  %v2797_v3 = vadd.f32 %v1870_v11, %v1628_v2  ;;  %v1987_v18 = vadd.f32 %v2794_v31, %v1986_v13  ;;  %v2703_v22 = vpop.f32.mrb[26].mxu1 }
 0x150   : > { %1959 = vst [vmem:[%s3708_s14 + $0xd0] sm:$0xff] %v2796_v12  ;;  %v2798_v26 = vadd.f32 %v2751_v44, %v2703_v22  ;;  %v1631_v0 = vpop.f32.mrb[27].mxu1  ;;  %v2029_v7 = vmul.f32 %v2796_v12, %v2796_v12 }
 0x151   : > { %1957 = vst [vmem:[%s3708_s14 + $0xc0] sm:$0xff] %v2797_v3  ;;  %v1988_v28 = vadd.f32 %v2797_v3, %v1987_v18  ;;  %v2027_v29 = vmul.f32 %v2797_v3, %v2797_v3  ;;  %v2057_v1 = vadd.f32 %v2056_v16, %v2026_v14  ;;  %v2799_v38 = vadd.f32 %v1873_v37, %v1631_v0 }
 0x152   : > { %v2754_v5 = vpop.f32.mrb[28].mxu0  ;;  %1960 = vst [vmem:[%s3708_s14 + $0xd8] sm:$0xff] %v2798_v26  ;;  %v2030_v43 = vmul.f32 %v2798_v26, %v2798_v26 }
 0x153   : > { %v1886_v24 = vpop.f32.mrb[29].mxu0  ;;  %v2058_v33 = vadd.f32 %v2057_v1, %v2027_v29  ;;  %1958 = vst [vmem:[%s3708_s14 + $0xc8] sm:$0xff] %v2799_v38  ;;  %v1989_v10 = vadd.f32 %v2799_v38, %v1988_v28  ;;  %v2028_v19 = vmul.f32 %v2799_v38, %v2799_v38 }
 0x154   : > { %v2755_v17 = vpop.f32.mrb[30].mxu0 }
 0x155   : > { %v1889_v32 = vpop.f32.mrb[31].mxu0  ;;  %v1990_v34 = vadd.f32 %v2796_v12, %v1989_v10  ;;  %v2059_v4 = vadd.f32 %v2058_v33, %v2028_v19  ;;  %v2706_v35 = vpop.f32.mrb[28].mxu1 }
 0x156   : > { %v2800_v41 = vadd.f32 %v2754_v5, %v2706_v35  ;;  %v1644_v42 = vpop.f32.mrb[29].mxu1 }
 0x157   : > { %v2060_v40 = vadd.f32 %v2059_v4, %v2029_v7  ;;  %v2801_v46 = vadd.f32 %v1886_v24, %v1644_v42  ;;  %v1991_v27 = vadd.f32 %v2798_v26, %v1990_v34  ;;  %v2707_v45 = vpop.f32.mrb[30].mxu1 }
 0x158   : > { %1963 = vst [vmem:[%s3708_s14 + $0xf0] sm:$0xff] %v2800_v41  ;;  %v2802_v48 = vadd.f32 %v2755_v17, %v2707_v45  ;;  %v1647_v49 = vpop.f32.mrb[31].mxu1  ;;  %v2033_v57 = vmul.f32 %v2800_v41, %v2800_v41 }
 0x159   : > { %1961 = vst [vmem:[%s3708_s14 + $0xe0] sm:$0xff] %v2801_v46  ;;  %v1992_v55 = vadd.f32 %v2801_v46, %v1991_v27  ;;  %v2031_v9 = vmul.f32 %v2801_v46, %v2801_v46  ;;  %v2061_v30 = vadd.f32 %v2060_v40, %v2030_v43  ;;  %v2803_v50 = vadd.f32 %v1889_v32, %v1647_v49 }
 0x15a   : > { %1964 = vst [vmem:[%s3708_s14 + $0xf8] sm:$0xff] %v2802_v48  ;;  %v2034_v60 = vmul.f32 %v2802_v48, %v2802_v48 }
 0x15b   : > { %v2062_v53 = vadd.f32 %v2061_v30, %v2031_v9  ;;  %1962 = vst [vmem:[%s3708_s14 + $0xe8] sm:$0xff] %v2803_v50  ;;  %v1993_v54 = vadd.f32 %v2803_v50, %v1992_v55  ;;  %v2032_v56 = vmul.f32 %v2803_v50, %v2803_v50 }
 0x15d   : > { %v1994_v59 = vadd.f32 %v2800_v41, %v1993_v54  ;;  %v2063_v15 = vadd.f32 %v2062_v53, %v2032_v56 }
 0x15f   : > { %v1995_v61 = vadd.f32 %v2802_v48, %v1994_v59  ;;  %v2064_v47 = vadd.f32 %v2063_v15, %v2033_v57 }
 0x161   : > { %v1996_v21 = vrot.slane %v1995_v61, 4  ;;  %v2065_v6 = vadd.f32 %v2064_v47, %v2034_v60 }
 0x163   : > { %v1997_v11 = vadd.f32 %v1996_v21, %v1995_v61  ;;  %v2066_v31 = vrot.slane %v2065_v6, 4 }
 0x165   : > { %v1998_v36 = vrot.slane %v1997_v11, 2  ;;  %v2067_v44 = vadd.f32 %v2066_v31, %v2065_v6 }
 0x167   : > { %v1999_v25 = vadd.f32 %v1998_v36, %v1997_v11  ;;  %v2068_v62 = vrot.slane %v2067_v44, 2 }
 0x169   : > { %v2000_v51 = vrot.slane %v1999_v25, 1  ;;  %v2069_v20 = vadd.f32 %v2068_v62, %v2067_v44 }
 0x16b   : > { %v2001_v37 = vadd.f32 %v2000_v51, %v1999_v25  ;;  %v2070_v52 = vrot.slane %v2069_v20, 1 }
 0x16d   : > { %2002 = vst [vmem:[%s3691_s11] sm:$0x1] %v2001_v37  ;;  %v2071_v58 = vadd.f32 %v2070_v52, %v2069_v20 }
 0x16f   : > { %2072 = vst [vmem:[%s3691_s11 + $0x1] sm:$0x1] %v2071_v58 }
 0x170 PF: > { %s16_s18 = sadd.s32 1, %s2876_s18  }
 0x171   : > { %p13_p5 = scmp.ge.s32.totalorder %s16_s18, 4  }
 0x173   :  { %15 = sbr.rel (!%p13_p5) target bundleno = 1 (0x1), region = 80 }

</bundles_post_ra>
